<compile_context>
chip_gen: v6e
topology: v6e:2x2x1
jax: 0.10.0
libtpu: 0.0.40
codegen_flags: <defaults>
</compile_context>

<pallas_src>
import functools

import jax
import jax.numpy as jnp
from jax.experimental import pallas as pl
from jax.experimental.pallas import tpu as pltpu


def _round_up(x, m):
    return (x + m - 1) // m * m


# ---------------------------------------------------------------------------
# Fused kernel: n_conv CG_CNN layers + avg-pool + MLP head
# ---------------------------------------------------------------------------
def _net_kernel(src_ref, dst_ref,                       # scalar-prefetch (SMEM)
                z_ref, dist_ref, wenv_ref, wdist_ref, bgate_ref,
                w1_ref, b1_ref, w2_ref, b2_ref, w3_ref, b3_ref,
                out_ref,
                env_ref, hsrc_ref, hdst_ref, hdist_ref,
                *, n_nodes, n_edges, feat, tile_e):
    layer = pl.program_id(0)
    et = pl.program_id(1)
    last_layer = pl.num_programs(0) - 1
    last_tile = pl.num_programs(1) - 1

    # --- initialize node state from Z at the very first grid step ---
    @pl.when((layer == 0) & (et == 0))
    def _():
        env_ref[...] = z_ref[...]

    # --- once per layer: project node state through the fused env weight ---
    #     [hsrc | hdst] = env @ [Wsrc | Wdst]  (one (N,F)@(F,4F) MXU matmul)
    @pl.when(et == 0)
    def _():
        h = jnp.dot(env_ref[...], wenv_ref[0],
                    preferred_element_type=jnp.float32)              # (N, 4F)
        hsrc_ref[...] = h[:, :2 * feat]
        hdst_ref[...] = h[:, 2 * feat:]

    # --- per edge tile: dist projection + fused gate bias ---
    hdist_ref[...] = (
        jnp.dot(dist_ref[...], wdist_ref[0],
                preferred_element_type=jnp.float32) + bgate_ref[0])  # (tile_e, 2F)

    # --- per edge: gather, gate, scatter-add (in-kernel segment-sum over dst) --
    base = et * tile_e

    def edge_body(le, carry):
        ge = base + le
        s = src_ref[ge]
        d = dst_ref[ge]
        pre = (hsrc_ref[pl.ds(s, 1), :]
               + hdst_ref[pl.ds(d, 1), :]
               + hdist_ref[pl.ds(le, 1), :])                         # (1, 2F)
        valid = (ge < n_edges).astype(jnp.float32)                   # mask padding
        m = (jax.nn.sigmoid(pre[:, :feat])
             * jax.nn.softplus(pre[:, feat:]) * valid)               # (1, F)
        env_ref[pl.ds(d, 1), :] = env_ref[pl.ds(d, 1), :] + m
        return carry

    jax.lax.fori_loop(0, tile_e, edge_body, 0, unroll=True)

    # --- fused readout: avg-pool over real nodes + Softplus MLP head ---
    @pl.when((layer == last_layer) & (et == last_tile))
    def _():
        pooled = jnp.sum(env_ref[...], axis=0, keepdims=True) * (1.0 / n_nodes)
        h1 = jax.nn.softplus(
            jnp.dot(pooled, w1_ref[...], preferred_element_type=jnp.float32)
            + b1_ref[...])
        h2 = jax.nn.softplus(
            jnp.dot(h1, w2_ref[...], preferred_element_type=jnp.float32)
            + b2_ref[...])
        out_ref[...] = (
            jnp.dot(h2, w3_ref[...], preferred_element_type=jnp.float32)
            + b3_ref[...])


# ---------------------------------------------------------------------------
# Parameter packing (done once, outside the per-call path)
#   per layer: wf (2F+10, F), bf (1,F), ws (2F+10, F), bs (1,F)
#   -> w_env  (n_conv, F, 4F)   rows of [wf|ws] that multiply env[src]/env[dst]
#      w_dist (n_conv, 10, 2F)  rows of [wf|ws] that multiply dist
#      b_gate (n_conv, 1, 2F)   [bf | bs]
# ---------------------------------------------------------------------------
def pack_params(params, *, n_conv, in_feats):
    f = in_feats
    w_env, w_dist, b_gate = [], [], []
    for i in range(n_conv):
        wf, bf, ws, bs = params[f"conv{i + 1}"]
        wg = jnp.concatenate([wf, ws], axis=1)                        # (2F+10, 2F)
        w_env.append(jnp.concatenate([wg[:f], wg[f:2 * f]], axis=1))  # (F, 4F)
        w_dist.append(wg[2 * f:])                                     # (10, 2F)
        b_gate.append(jnp.concatenate([bf, bs], axis=1))              # (1, 2F)
    return {
        "w_env": jnp.stack(w_env),
        "w_dist": jnp.stack(w_dist),
        "b_gate": jnp.stack(b_gate),
        "mlp": params["mlp"],
    }


# ---------------------------------------------------------------------------
# Full Net forward (single pallas_call)
# ---------------------------------------------------------------------------
@functools.partial(jax.jit, static_argnames=("n_conv", "tile_e"))
def net_forward(packed, z, src, dst, dist, *, n_conv, tile_e=16):
    n, feat = z.shape
    e = src.shape[0]
    edge_feat = dist.shape[1]

    n_pad = _round_up(n, 8)
    e_pad = _round_up(e, tile_e)
    n_tiles = e_pad // tile_e

    z_pad = jnp.pad(z, ((0, n_pad - n), (0, 0)))
    dist_pad = jnp.pad(dist, ((0, e_pad - e), (0, 0)))
    src_pad = jnp.pad(src.astype(jnp.int32), (0, e_pad - e))
    dst_pad = jnp.pad(dst.astype(jnp.int32), (0, e_pad - e))

    w_env = packed["w_env"]      # (n_conv, F, 4F)
    w_dist = packed["w_dist"]    # (n_conv, 10, 2F)
    b_gate = packed["b_gate"]    # (n_conv, 1, 2F)
    w1, b1, w2, b2, w3, b3 = packed["mlp"]

    kernel = functools.partial(
        _net_kernel, n_nodes=n, n_edges=e, feat=feat, tile_e=tile_e)

    grid_spec = pltpu.PrefetchScalarGridSpec(
        num_scalar_prefetch=2,                     # src, dst -> SMEM
        grid=(n_conv, n_tiles),
        in_specs=[
            pl.BlockSpec((n_pad, feat), lambda l, t, s, d: (0, 0)),            # z
            pl.BlockSpec((tile_e, edge_feat), lambda l, t, s, d: (t, 0)),      # dist
            pl.BlockSpec((1, feat, 4 * feat), lambda l, t, s, d: (l, 0, 0)),   # w_env
            pl.BlockSpec((1, edge_feat, 2 * feat), lambda l, t, s, d: (l, 0, 0)),  # w_dist
            pl.BlockSpec((1, 1, 2 * feat), lambda l, t, s, d: (l, 0, 0)),      # b_gate
            pl.BlockSpec(w1.shape, lambda l, t, s, d: (0, 0)),
            pl.BlockSpec(b1.shape, lambda l, t, s, d: (0, 0)),
            pl.BlockSpec(w2.shape, lambda l, t, s, d: (0, 0)),
            pl.BlockSpec(b2.shape, lambda l, t, s, d: (0, 0)),
            pl.BlockSpec(w3.shape, lambda l, t, s, d: (0, 0)),
            pl.BlockSpec(b3.shape, lambda l, t, s, d: (0, 0)),
        ],
        out_specs=pl.BlockSpec((1, 1), lambda l, t, s, d: (0, 0)),
        scratch_shapes=[
            pltpu.VMEM((n_pad, feat), jnp.float32),        # env (node state)
            pltpu.VMEM((n_pad, 2 * feat), jnp.float32),    # env @ Wsrc
            pltpu.VMEM((n_pad, 2 * feat), jnp.float32),    # env @ Wdst
            pltpu.VMEM((tile_e, 2 * feat), jnp.float32),   # dist tile @ Wdist + b
        ],
    )

    return pl.pallas_call(
        kernel,
        out_shape=jax.ShapeDtypeStruct((1, 1), jnp.float32),
        grid_spec=grid_spec,
        compiler_params=pltpu.CompilerParams(
            dimension_semantics=("arbitrary", "arbitrary")),
    )(src_pad, dst_pad, z_pad, dist_pad, w_env, w_dist, b_gate,
      w1, b1, w2, b2, w3, b3)


# ---------------------------------------------------------------------------
# Pure-JAX reference for verification (uses the original, unpacked params)
# ---------------------------------------------------------------------------
def net_forward_ref(params, z, src, dst, dist, *, n_conv):
    out = z
    n = z.shape[0]
    for i in range(n_conv):
        wf, bf, ws, bs = params[f"conv{i + 1}"]
        msg = jnp.concatenate([out[src], out[dst], dist], axis=-1)
        m = jax.nn.sigmoid(msg @ wf + bf) * jax.nn.softplus(msg @ ws + bs)
        agg = jax.ops.segment_sum(m, dst, num_segments=n)
        out = out + agg
    w1, b1, w2, b2, w3, b3 = params["mlp"]
    pooled = jnp.mean(out, axis=0, keepdims=True)
    h1 = jax.nn.softplus(pooled @ w1 + b1)
    h2 = jax.nn.softplus(h1 @ w2 + b2)
    return h2 @ w3 + b3


def _init_linear(key, fan_in, fan_out):
    # PyTorch nn.Linear default: U(-1/sqrt(fan_in), 1/sqrt(fan_in)); stored (in, out).
    kw, kb = jax.random.split(key)
    bound = 1.0 / jnp.sqrt(fan_in)
    w = jax.random.uniform(kw, (fan_in, fan_out), jnp.float32, -bound, bound)
    b = jax.random.uniform(kb, (1, fan_out), jnp.float32, -bound, bound)
    return w, b


if __name__ == "__main__":
    in_feats = 16
    n_conv = 3
    neuron_ratios = [[2], [2, 1]]       # mlp21: F -> 2F, mlp22: 2F -> F, mlp23: F -> 1
    edge_feat = 10

    key = jax.random.PRNGKey(0)
    keys = jax.random.split(key, 12)

    # --- graph: N nodes, E_rand random directed edges + N self-loops (zero dist) ---
    n_nodes, n_rand_edges = 8, 12
    src_r = jax.random.randint(keys[0], (n_rand_edges,), 0, n_nodes)
    dst_r = jax.random.randint(keys[1], (n_rand_edges,), 0, n_nodes)
    dist_r = jax.random.normal(keys[2], (n_rand_edges, edge_feat), jnp.float32)
    loop = jnp.arange(n_nodes, dtype=src_r.dtype)
    src = jnp.concatenate([src_r, loop])
    dst = jnp.concatenate([dst_r, loop])
    dist = jnp.concatenate(
        [dist_r, jnp.zeros((n_nodes, edge_feat), jnp.float32)], axis=0)
    z = jax.random.normal(keys[3], (n_nodes, in_feats), jnp.float32)

    # --- parameters (PyTorch layout, then packed once for the fused kernel) ---
    params = {}
    for i in range(n_conv):
        kf, ks = jax.random.split(keys[4 + i])
        wf, bf = _init_linear(kf, 2 * in_feats + edge_feat, in_feats)
        ws, bs = _init_linear(ks, 2 * in_feats + edge_feat, in_feats)
        params[f"conv{i + 1}"] = (wf, bf, ws, bs)
    h1 = neuron_ratios[1][0] * in_feats
    h2 = neuron_ratios[1][1] * in_feats
    w1, b1 = _init_linear(keys[8], in_feats, h1)
    w2, b2 = _init_linear(keys[9], h1, h2)
    w3, b3 = _init_linear(keys[10], h2, 1)
    params["mlp"] = (w1, b1, w2, b2, w3, b3)

    packed = pack_params(params, n_conv=n_conv, in_feats=in_feats)

    out = net_forward(packed, z, src, dst, dist, n_conv=n_conv, tile_e=16)
    out = jax.block_until_ready(out)

    ref = net_forward_ref(params, z, src, dst, dist, n_conv=n_conv)
    assert out.shape == (1, 1)
    assert jnp.allclose(out, ref, atol=1e-3, rtol=1e-3), (out, ref)

    print("KERNEL_OK")
</pallas_src>

<mosaic_0001>
module attributes {stable_mosaic.version = 11 : i64} {
  func.func @_net_kernel(%arg0: i32, %arg1: i32, %arg2: memref<32xi32, #tpu.memory_space<smem>>, %arg3: memref<32xi32, #tpu.memory_space<smem>>, %arg4: memref<8x16xf32, #tpu.memory_space<vmem>>, %arg5: memref<16x10xf32, #tpu.memory_space<vmem>>, %arg6: memref<1x16x64xf32, #tpu.memory_space<vmem>>, %arg7: memref<1x10x32xf32, #tpu.memory_space<vmem>>, %arg8: memref<1x1x32xf32, #tpu.memory_space<vmem>>, %arg9: memref<16x32xf32, #tpu.memory_space<vmem>>, %arg10: memref<1x32xf32, #tpu.memory_space<vmem>>, %arg11: memref<32x16xf32, #tpu.memory_space<vmem>>, %arg12: memref<1x16xf32, #tpu.memory_space<vmem>>, %arg13: memref<16x1xf32, #tpu.memory_space<vmem>>, %arg14: memref<1x1xf32, #tpu.memory_space<vmem>>, %arg15: memref<1x1xf32, #tpu.memory_space<vmem>>, %arg16: memref<8x16xf32, #tpu.memory_space<vmem>>, %arg17: memref<8x32xf32, #tpu.memory_space<vmem>>, %arg18: memref<8x32xf32, #tpu.memory_space<vmem>>, %arg19: memref<16x32xf32, #tpu.memory_space<vmem>>) attributes {dimension_semantics = [#tpu.dimension_semantics<arbitrary>, #tpu.dimension_semantics<arbitrary>], iteration_bounds = array<i64: 3, 2>, scalar_prefetch = 2 : i64, scratch_operands = 4 : i64, tpu.core_type = #tpu.core_type<tc>, window_params = [{pipeline_mode = #tpu.pipeline_mode<synchronous>, transform_indices = @transform_0, window_bounds = array<i64: 8, 16>}, {transform_indices = @transform_1, window_bounds = array<i64: 16, 10>}, {transform_indices = @transform_2, window_bounds = array<i64: 1, 16, 64>}, {transform_indices = @transform_3, window_bounds = array<i64: 1, 10, 32>}, {transform_indices = @transform_4, window_bounds = array<i64: 1, 1, 32>}, {pipeline_mode = #tpu.pipeline_mode<synchronous>, transform_indices = @transform_5, window_bounds = array<i64: 16, 32>}, {pipeline_mode = #tpu.pipeline_mode<synchronous>, transform_indices = @transform_6, window_bounds = array<i64: 1, 32>}, {pipeline_mode = #tpu.pipeline_mode<synchronous>, transform_indices = @transform_7, window_bounds = array<i64: 32, 16>}, {pipeline_mode = #tpu.pipeline_mode<synchronous>, transform_indices = @transform_8, window_bounds = array<i64: 1, 16>}, {pipeline_mode = #tpu.pipeline_mode<synchronous>, transform_indices = @transform_9, window_bounds = array<i64: 16, 1>}, {pipeline_mode = #tpu.pipeline_mode<synchronous>, transform_indices = @transform_10, window_bounds = array<i64: 1, 1>}, {pipeline_mode = #tpu.pipeline_mode<synchronous>, transform_indices = @transform_11, window_bounds = array<i64: 1, 1>}]} {
    %c0_i32 = arith.constant 0 : i32
    %0 = arith.cmpi eq, %arg0, %c0_i32 : i32
    %c0_i32_0 = arith.constant 0 : i32
    %1 = arith.cmpi eq, %arg1, %c0_i32_0 : i32
    %2 = arith.andi %0, %1 : i1
    %3 = arith.extui %2 : i1 to i32
    %c0_i32_1 = arith.constant 0 : i32
    %4 = arith.cmpi ne, %3, %c0_i32_1 : i32
    scf.if %4 {
      %c0_161 = arith.constant 0 : index
      %c0_162 = arith.constant 0 : index
      %743 = vector.load %arg4[%c0_161, %c0_162] : memref<8x16xf32, #tpu.memory_space<vmem>>, vector<8x16xf32>
      %c0_163 = arith.constant 0 : index
      %c0_164 = arith.constant 0 : index
      %744 = vector.load %arg16[%c0_163, %c0_164] : memref<8x16xf32, #tpu.memory_space<vmem>>, vector<8x16xf32>
      tpu.vector_store %arg16[%c0_163, %c0_164], %743 {strides = array<i32>} : memref<8x16xf32, #tpu.memory_space<vmem>>, vector<8x16xf32>,
    } else {
    }
    %c0_i32_2 = arith.constant 0 : i32
    %5 = arith.cmpi eq, %arg1, %c0_i32_2 : i32
    %6 = arith.extui %5 : i1 to i32
    %c0_i32_3 = arith.constant 0 : i32
    %7 = arith.cmpi ne, %6, %c0_i32_3 : i32
    scf.if %7 {
      %c0_161 = arith.constant 0 : index
      %c0_162 = arith.constant 0 : index
      %743 = vector.load %arg16[%c0_161, %c0_162] : memref<8x16xf32, #tpu.memory_space<vmem>>, vector<8x16xf32>
      %c0_163 = arith.constant 0 : index
      %c0_164 = arith.constant 0 : index
      %c0_165 = arith.constant 0 : index
      %744 = vector.load %arg6[%c0_163, %c0_164, %c0_165] : memref<1x16x64xf32, #tpu.memory_space<vmem>>, vector<1x16x64xf32>
      %745 = vector.shape_cast %744 : vector<1x16x64xf32> to vector<16x64xf32>
      %cst_166 = arith.constant dense<0.000000e+00> : vector<8x64xf32>
      %746 = tpu.matmul %743, %745, %cst_166 {dimension_numbers = #tpu.dot_dimension_numbers<[1], [0], [0], [1], [0, 0, 1, 1], [], []>} : vector<8x16xf32>, vector<16x64xf32>, vector<8x64xf32> -> vector<8x64xf32>
      %747 = vector.extract_strided_slice %746 {offsets = [0, 0], sizes = [8, 32], strides = [1, 1]} : vector<8x64xf32> to vector<8x32xf32>
      %c0_167 = arith.constant 0 : index
      %c0_168 = arith.constant 0 : index
      %748 = vector.load %arg17[%c0_167, %c0_168] : memref<8x32xf32, #tpu.memory_space<vmem>>, vector<8x32xf32>
      tpu.vector_store %arg17[%c0_167, %c0_168], %747 {strides = array<i32>} : memref<8x32xf32, #tpu.memory_space<vmem>>, vector<8x32xf32>,
      %749 = vector.extract_strided_slice %746 {offsets = [0, 32], sizes = [8, 32], strides = [1, 1]} : vector<8x64xf32> to vector<8x32xf32>
      %c0_169 = arith.constant 0 : index
      %c0_170 = arith.constant 0 : index
      %750 = vector.load %arg18[%c0_169, %c0_170] : memref<8x32xf32, #tpu.memory_space<vmem>>, vector<8x32xf32>
      tpu.vector_store %arg18[%c0_169, %c0_170], %749 {strides = array<i32>} : memref<8x32xf32, #tpu.memory_space<vmem>>, vector<8x32xf32>,
    } else {
    }
    %c0 = arith.constant 0 : index
    %c0_4 = arith.constant 0 : index
    %8 = vector.load %arg5[%c0, %c0_4] : memref<16x10xf32, #tpu.memory_space<vmem>>, vector<16x10xf32>
    %c0_5 = arith.constant 0 : index
    %c0_6 = arith.constant 0 : index
    %c0_7 = arith.constant 0 : index
    %9 = vector.load %arg7[%c0_5, %c0_6, %c0_7] : memref<1x10x32xf32, #tpu.memory_space<vmem>>, vector<1x10x32xf32>
    %10 = vector.shape_cast %9 : vector<1x10x32xf32> to vector<10x32xf32>
    %cst = arith.constant dense<0.000000e+00> : vector<16x32xf32>
    %11 = tpu.matmul %8, %10, %cst {dimension_numbers = #tpu.dot_dimension_numbers<[1], [0], [0], [1], [0, 0, 1, 1], [], []>} : vector<16x10xf32>, vector<10x32xf32>, vector<16x32xf32> -> vector<16x32xf32>
    %c0_8 = arith.constant 0 : index
    %c0_9 = arith.constant 0 : index
    %c0_10 = arith.constant 0 : index
    %12 = vector.load %arg8[%c0_8, %c0_9, %c0_10] : memref<1x1x32xf32, #tpu.memory_space<vmem>>, vector<1x1x32xf32>
    %13 = vector.shape_cast %12 : vector<1x1x32xf32> to vector<1x32xf32>
    %14 = vector.broadcast %13 : vector<1x32xf32> to vector<16x32xf32>
    %15 = arith.addf %11, %14 : vector<16x32xf32>
    %c0_11 = arith.constant 0 : index
    %c0_12 = arith.constant 0 : index
    %16 = vector.load %arg19[%c0_11, %c0_12] : memref<16x32xf32, #tpu.memory_space<vmem>>, vector<16x32xf32>
    tpu.vector_store %arg19[%c0_11, %c0_12], %15 {strides = array<i32>} : memref<16x32xf32, #tpu.memory_space<vmem>>, vector<16x32xf32>,
    %c16_i32 = arith.constant 16 : i32
    %17 = arith.muli %arg1, %c16_i32 : i32
    %c0_i32_13 = arith.constant 0 : i32
    %18 = arith.addi %17, %c0_i32_13 : i32
    %19 = arith.index_cast %18 : i32 to index
    %20 = memref.load %arg2[%19] : memref<32xi32, #tpu.memory_space<smem>>
    %21 = arith.index_cast %18 : i32 to index
    %22 = memref.load %arg3[%21] : memref<32xi32, #tpu.memory_space<smem>>
    %23 = arith.index_cast %20 : i32 to index
    %c0_14 = arith.constant 0 : index
    %24 = vector.load %arg17[%23, %c0_14] : memref<8x32xf32, #tpu.memory_space<vmem>>, vector<1x32xf32>
    %25 = arith.index_cast %22 : i32 to index
    %c0_15 = arith.constant 0 : index
    %26 = vector.load %arg18[%25, %c0_15] : memref<8x32xf32, #tpu.memory_space<vmem>>, vector<1x32xf32>
    %27 = arith.addf %24, %26 : vector<1x32xf32>
    %28 = arith.index_cast %c0_i32_13 : i32 to index
    %c0_16 = arith.constant 0 : index
    %29 = vector.load %arg19[%28, %c0_16] : memref<16x32xf32, #tpu.memory_space<vmem>>, vector<1x32xf32>
    %30 = arith.addf %27, %29 : vector<1x32xf32>
    %c20_i32 = arith.constant 20 : i32
    %31 = arith.cmpi slt, %18, %c20_i32 : i32
    %32 = arith.extui %31 : i1 to i32
    %33 = arith.sitofp %32 : i32 to f32
    %34 = vector.extract_strided_slice %30 {offsets = [0, 0], sizes = [1, 16], strides = [1, 1]} : vector<1x32xf32> to vector<1x16xf32>
    %35 = arith.negf %34 : vector<1x16xf32>
    %36 = math.exp %35 : vector<1x16xf32>
    %cst_17 = arith.constant 1.000000e+00 : f32
    %37 = vector.broadcast %cst_17 : f32 to vector<1x16xf32>
    %38 = arith.addf %37, %36 : vector<1x16xf32>
    %39 = arith.divf %37, %38 : vector<1x16xf32>
    %40 = vector.extract_strided_slice %30 {offsets = [0, 16], sizes = [1, 16], strides = [1, 1]} : vector<1x32xf32> to vector<1x16xf32>
    %cst_18 = arith.constant 0.000000e+00 : f32
    %41 = vector.broadcast %cst_18 : f32 to vector<1x16xf32>
    %42 = arith.maximumf %40, %41 : vector<1x16xf32>
    %43 = vector.broadcast %cst_18 : f32 to vector<1x16xf32>
    %44 = arith.subf %40, %43 : vector<1x16xf32>
    %45 = arith.cmpf one, %44, %44 : vector<1x16xf32>
    %46 = vector.broadcast %cst_18 : f32 to vector<1x16xf32>
    %47 = arith.addf %40, %46 : vector<1x16xf32>
    %48 = math.absf %44 : vector<1x16xf32>
    %cst_19 = arith.constant 0.000000e+00 : f32
    %49 = vector.broadcast %cst_19 : f32 to vector<1x16xf32>
    %50 = arith.subf %49, %48 : vector<1x16xf32>
    %51 = math.exp %50 : vector<1x16xf32>
    %52 = math.log1p %51 : vector<1x16xf32>
    %53 = arith.addf %42, %52 : vector<1x16xf32>
    %54 = arith.select %45, %47, %53 : vector<1x16xi1>, vector<1x16xf32>
    %55 = arith.mulf %39, %54 : vector<1x16xf32>
    %56 = vector.broadcast %33 : f32 to vector<1x16xf32>
    %57 = arith.mulf %55, %56 : vector<1x16xf32>
    %58 = arith.index_cast %22 : i32 to index
    %c0_20 = arith.constant 0 : index
    %59 = vector.load %arg16[%58, %c0_20] : memref<8x16xf32, #tpu.memory_space<vmem>>, vector<1x16xf32>
    %60 = arith.addf %59, %57 : vector<1x16xf32>
    %61 = arith.index_cast %22 : i32 to index
    %c0_21 = arith.constant 0 : index
    %62 = vector.load %arg16[%61, %c0_21] : memref<8x16xf32, #tpu.memory_space<vmem>>, vector<1x16xf32>
    tpu.vector_store %arg16[%61, %c0_21], %60 {strides = array<i32>} : memref<8x16xf32, #tpu.memory_space<vmem>>, vector<1x16xf32>,
    %c1_i32 = arith.constant 1 : i32
    %63 = arith.addi %17, %c1_i32 : i32
    %64 = arith.index_cast %63 : i32 to index
    %65 = memref.load %arg2[%64] : memref<32xi32, #tpu.memory_space<smem>>
    %66 = arith.index_cast %63 : i32 to index
    %67 = memref.load %arg3[%66] : memref<32xi32, #tpu.memory_space<smem>>
    %68 = arith.index_cast %65 : i32 to index
    %c0_22 = arith.constant 0 : index
    %69 = vector.load %arg17[%68, %c0_22] : memref<8x32xf32, #tpu.memory_space<vmem>>, vector<1x32xf32>
    %70 = arith.index_cast %67 : i32 to index
    %c0_23 = arith.constant 0 : index
    %71 = vector.load %arg18[%70, %c0_23] : memref<8x32xf32, #tpu.memory_space<vmem>>, vector<1x32xf32>
    %72 = arith.addf %69, %71 : vector<1x32xf32>
    %73 = arith.index_cast %c1_i32 : i32 to index
    %c0_24 = arith.constant 0 : index
    %74 = vector.load %arg19[%73, %c0_24] : memref<16x32xf32, #tpu.memory_space<vmem>>, vector<1x32xf32>
    %75 = arith.addf %72, %74 : vector<1x32xf32>
    %c20_i32_25 = arith.constant 20 : i32
    %76 = arith.cmpi slt, %63, %c20_i32_25 : i32
    %77 = arith.extui %76 : i1 to i32
    %78 = arith.sitofp %77 : i32 to f32
    %79 = vector.extract_strided_slice %75 {offsets = [0, 0], sizes = [1, 16], strides = [1, 1]} : vector<1x32xf32> to vector<1x16xf32>
    %80 = arith.negf %79 : vector<1x16xf32>
    %81 = math.exp %80 : vector<1x16xf32>
    %cst_26 = arith.constant 1.000000e+00 : f32
    %82 = vector.broadcast %cst_26 : f32 to vector<1x16xf32>
    %83 = arith.addf %82, %81 : vector<1x16xf32>
    %84 = arith.divf %82, %83 : vector<1x16xf32>
    %85 = vector.extract_strided_slice %75 {offsets = [0, 16], sizes = [1, 16], strides = [1, 1]} : vector<1x32xf32> to vector<1x16xf32>
    %cst_27 = arith.constant 0.000000e+00 : f32
    %86 = vector.broadcast %cst_27 : f32 to vector<1x16xf32>
    %87 = arith.maximumf %85, %86 : vector<1x16xf32>
    %88 = vector.broadcast %cst_27 : f32 to vector<1x16xf32>
    %89 = arith.subf %85, %88 : vector<1x16xf32>
    %90 = arith.cmpf one, %89, %89 : vector<1x16xf32>
    %91 = vector.broadcast %cst_27 : f32 to vector<1x16xf32>
    %92 = arith.addf %85, %91 : vector<1x16xf32>
    %93 = math.absf %89 : vector<1x16xf32>
    %cst_28 = arith.constant 0.000000e+00 : f32
    %94 = vector.broadcast %cst_28 : f32 to vector<1x16xf32>
    %95 = arith.subf %94, %93 : vector<1x16xf32>
    %96 = math.exp %95 : vector<1x16xf32>
    %97 = math.log1p %96 : vector<1x16xf32>
    %98 = arith.addf %87, %97 : vector<1x16xf32>
    %99 = arith.select %90, %92, %98 : vector<1x16xi1>, vector<1x16xf32>
    %100 = arith.mulf %84, %99 : vector<1x16xf32>
    %101 = vector.broadcast %78 : f32 to vector<1x16xf32>
    %102 = arith.mulf %100, %101 : vector<1x16xf32>
    %103 = arith.index_cast %67 : i32 to index
    %c0_29 = arith.constant 0 : index
    %104 = vector.load %arg16[%103, %c0_29] : memref<8x16xf32, #tpu.memory_space<vmem>>, vector<1x16xf32>
    %105 = arith.addf %104, %102 : vector<1x16xf32>
    %106 = arith.index_cast %67 : i32 to index
    %c0_30 = arith.constant 0 : index
    %107 = vector.load %arg16[%106, %c0_30] : memref<8x16xf32, #tpu.memory_space<vmem>>, vector<1x16xf32>
    tpu.vector_store %arg16[%106, %c0_30], %105 {strides = array<i32>} : memref<8x16xf32, #tpu.memory_space<vmem>>, vector<1x16xf32>,
    %c2_i32 = arith.constant 2 : i32
    %108 = arith.addi %17, %c2_i32 : i32
    %109 = arith.index_cast %108 : i32 to index
    %110 = memref.load %arg2[%109] : memref<32xi32, #tpu.memory_space<smem>>
    %111 = arith.index_cast %108 : i32 to index
    %112 = memref.load %arg3[%111] : memref<32xi32, #tpu.memory_space<smem>>
    %113 = arith.index_cast %110 : i32 to index
    %c0_31 = arith.constant 0 : index
    %114 = vector.load %arg17[%113, %c0_31] : memref<8x32xf32, #tpu.memory_space<vmem>>, vector<1x32xf32>
    %115 = arith.index_cast %112 : i32 to index
    %c0_32 = arith.constant 0 : index
    %116 = vector.load %arg18[%115, %c0_32] : memref<8x32xf32, #tpu.memory_space<vmem>>, vector<1x32xf32>
    %117 = arith.addf %114, %116 : vector<1x32xf32>
    %118 = arith.index_cast %c2_i32 : i32 to index
    %c0_33 = arith.constant 0 : index
    %119 = vector.load %arg19[%118, %c0_33] : memref<16x32xf32, #tpu.memory_space<vmem>>, vector<1x32xf32>
    %120 = arith.addf %117, %119 : vector<1x32xf32>
    %c20_i32_34 = arith.constant 20 : i32
    %121 = arith.cmpi slt, %108, %c20_i32_34 : i32
    %122 = arith.extui %121 : i1 to i32
    %123 = arith.sitofp %122 : i32 to f32
    %124 = vector.extract_strided_slice %120 {offsets = [0, 0], sizes = [1, 16], strides = [1, 1]} : vector<1x32xf32> to vector<1x16xf32>
    %125 = arith.negf %124 : vector<1x16xf32>
    %126 = math.exp %125 : vector<1x16xf32>
    %cst_35 = arith.constant 1.000000e+00 : f32
    %127 = vector.broadcast %cst_35 : f32 to vector<1x16xf32>
    %128 = arith.addf %127, %126 : vector<1x16xf32>
    %129 = arith.divf %127, %128 : vector<1x16xf32>
    %130 = vector.extract_strided_slice %120 {offsets = [0, 16], sizes = [1, 16], strides = [1, 1]} : vector<1x32xf32> to vector<1x16xf32>
    %cst_36 = arith.constant 0.000000e+00 : f32
    %131 = vector.broadcast %cst_36 : f32 to vector<1x16xf32>
    %132 = arith.maximumf %130, %131 : vector<1x16xf32>
    %133 = vector.broadcast %cst_36 : f32 to vector<1x16xf32>
    %134 = arith.subf %130, %133 : vector<1x16xf32>
    %135 = arith.cmpf one, %134, %134 : vector<1x16xf32>
    %136 = vector.broadcast %cst_36 : f32 to vector<1x16xf32>
    %137 = arith.addf %130, %136 : vector<1x16xf32>
    %138 = math.absf %134 : vector<1x16xf32>
    %cst_37 = arith.constant 0.000000e+00 : f32
    %139 = vector.broadcast %cst_37 : f32 to vector<1x16xf32>
    %140 = arith.subf %139, %138 : vector<1x16xf32>
    %141 = math.exp %140 : vector<1x16xf32>
    %142 = math.log1p %141 : vector<1x16xf32>
    %143 = arith.addf %132, %142 : vector<1x16xf32>
    %144 = arith.select %135, %137, %143 : vector<1x16xi1>, vector<1x16xf32>
    %145 = arith.mulf %129, %144 : vector<1x16xf32>
    %146 = vector.broadcast %123 : f32 to vector<1x16xf32>
    %147 = arith.mulf %145, %146 : vector<1x16xf32>
    %148 = arith.index_cast %112 : i32 to index
    %c0_38 = arith.constant 0 : index
    %149 = vector.load %arg16[%148, %c0_38] : memref<8x16xf32, #tpu.memory_space<vmem>>, vector<1x16xf32>
    %150 = arith.addf %149, %147 : vector<1x16xf32>
    %151 = arith.index_cast %112 : i32 to index
    %c0_39 = arith.constant 0 : index
    %152 = vector.load %arg16[%151, %c0_39] : memref<8x16xf32, #tpu.memory_space<vmem>>, vector<1x16xf32>
    tpu.vector_store %arg16[%151, %c0_39], %150 {strides = array<i32>} : memref<8x16xf32, #tpu.memory_space<vmem>>, vector<1x16xf32>,
    %c3_i32 = arith.constant 3 : i32
    %153 = arith.addi %17, %c3_i32 : i32
    %154 = arith.index_cast %153 : i32 to index
    %155 = memref.load %arg2[%154] : memref<32xi32, #tpu.memory_space<smem>>
    %156 = arith.index_cast %153 : i32 to index
    %157 = memref.load %arg3[%156] : memref<32xi32, #tpu.memory_space<smem>>
    %158 = arith.index_cast %155 : i32 to index
    %c0_40 = arith.constant 0 : index
    %159 = vector.load %arg17[%158, %c0_40] : memref<8x32xf32, #tpu.memory_space<vmem>>, vector<1x32xf32>
    %160 = arith.index_cast %157 : i32 to index
    %c0_41 = arith.constant 0 : index
    %161 = vector.load %arg18[%160, %c0_41] : memref<8x32xf32, #tpu.memory_space<vmem>>, vector<1x32xf32>
    %162 = arith.addf %159, %161 : vector<1x32xf32>
    %163 = arith.index_cast %c3_i32 : i32 to index
    %c0_42 = arith.constant 0 : index
    %164 = vector.load %arg19[%163, %c0_42] : memref<16x32xf32, #tpu.memory_space<vmem>>, vector<1x32xf32>
    %165 = arith.addf %162, %164 : vector<1x32xf32>
    %c20_i32_43 = arith.constant 20 : i32
    %166 = arith.cmpi slt, %153, %c20_i32_43 : i32
    %167 = arith.extui %166 : i1 to i32
    %168 = arith.sitofp %167 : i32 to f32
    %169 = vector.extract_strided_slice %165 {offsets = [0, 0], sizes = [1, 16], strides = [1, 1]} : vector<1x32xf32> to vector<1x16xf32>
    %170 = arith.negf %169 : vector<1x16xf32>
    %171 = math.exp %170 : vector<1x16xf32>
    %cst_44 = arith.constant 1.000000e+00 : f32
    %172 = vector.broadcast %cst_44 : f32 to vector<1x16xf32>
    %173 = arith.addf %172, %171 : vector<1x16xf32>
    %174 = arith.divf %172, %173 : vector<1x16xf32>
    %175 = vector.extract_strided_slice %165 {offsets = [0, 16], sizes = [1, 16], strides = [1, 1]} : vector<1x32xf32> to vector<1x16xf32>
    %cst_45 = arith.constant 0.000000e+00 : f32
    %176 = vector.broadcast %cst_45 : f32 to vector<1x16xf32>
    %177 = arith.maximumf %175, %176 : vector<1x16xf32>
    %178 = vector.broadcast %cst_45 : f32 to vector<1x16xf32>
    %179 = arith.subf %175, %178 : vector<1x16xf32>
    %180 = arith.cmpf one, %179, %179 : vector<1x16xf32>
    %181 = vector.broadcast %cst_45 : f32 to vector<1x16xf32>
    %182 = arith.addf %175, %181 : vector<1x16xf32>
    %183 = math.absf %179 : vector<1x16xf32>
    %cst_46 = arith.constant 0.000000e+00 : f32
    %184 = vector.broadcast %cst_46 : f32 to vector<1x16xf32>
    %185 = arith.subf %184, %183 : vector<1x16xf32>
    %186 = math.exp %185 : vector<1x16xf32>
    %187 = math.log1p %186 : vector<1x16xf32>
    %188 = arith.addf %177, %187 : vector<1x16xf32>
    %189 = arith.select %180, %182, %188 : vector<1x16xi1>, vector<1x16xf32>
    %190 = arith.mulf %174, %189 : vector<1x16xf32>
    %191 = vector.broadcast %168 : f32 to vector<1x16xf32>
    %192 = arith.mulf %190, %191 : vector<1x16xf32>
    %193 = arith.index_cast %157 : i32 to index
    %c0_47 = arith.constant 0 : index
    %194 = vector.load %arg16[%193, %c0_47] : memref<8x16xf32, #tpu.memory_space<vmem>>, vector<1x16xf32>
    %195 = arith.addf %194, %192 : vector<1x16xf32>
    %196 = arith.index_cast %157 : i32 to index
    %c0_48 = arith.constant 0 : index
    %197 = vector.load %arg16[%196, %c0_48] : memref<8x16xf32, #tpu.memory_space<vmem>>, vector<1x16xf32>
    tpu.vector_store %arg16[%196, %c0_48], %195 {strides = array<i32>} : memref<8x16xf32, #tpu.memory_space<vmem>>, vector<1x16xf32>,
    %c4_i32 = arith.constant 4 : i32
    %198 = arith.addi %17, %c4_i32 : i32
    %199 = arith.index_cast %198 : i32 to index
    %200 = memref.load %arg2[%199] : memref<32xi32, #tpu.memory_space<smem>>
    %201 = arith.index_cast %198 : i32 to index
    %202 = memref.load %arg3[%201] : memref<32xi32, #tpu.memory_space<smem>>
    %203 = arith.index_cast %200 : i32 to index
    %c0_49 = arith.constant 0 : index
    %204 = vector.load %arg17[%203, %c0_49] : memref<8x32xf32, #tpu.memory_space<vmem>>, vector<1x32xf32>
    %205 = arith.index_cast %202 : i32 to index
    %c0_50 = arith.constant 0 : index
    %206 = vector.load %arg18[%205, %c0_50] : memref<8x32xf32, #tpu.memory_space<vmem>>, vector<1x32xf32>
    %207 = arith.addf %204, %206 : vector<1x32xf32>
    %208 = arith.index_cast %c4_i32 : i32 to index
    %c0_51 = arith.constant 0 : index
    %209 = vector.load %arg19[%208, %c0_51] : memref<16x32xf32, #tpu.memory_space<vmem>>, vector<1x32xf32>
    %210 = arith.addf %207, %209 : vector<1x32xf32>
    %c20_i32_52 = arith.constant 20 : i32
    %211 = arith.cmpi slt, %198, %c20_i32_52 : i32
    %212 = arith.extui %211 : i1 to i32
    %213 = arith.sitofp %212 : i32 to f32
    %214 = vector.extract_strided_slice %210 {offsets = [0, 0], sizes = [1, 16], strides = [1, 1]} : vector<1x32xf32> to vector<1x16xf32>
    %215 = arith.negf %214 : vector<1x16xf32>
    %216 = math.exp %215 : vector<1x16xf32>
    %cst_53 = arith.constant 1.000000e+00 : f32
    %217 = vector.broadcast %cst_53 : f32 to vector<1x16xf32>
    %218 = arith.addf %217, %216 : vector<1x16xf32>
    %219 = arith.divf %217, %218 : vector<1x16xf32>
    %220 = vector.extract_strided_slice %210 {offsets = [0, 16], sizes = [1, 16], strides = [1, 1]} : vector<1x32xf32> to vector<1x16xf32>
    %cst_54 = arith.constant 0.000000e+00 : f32
    %221 = vector.broadcast %cst_54 : f32 to vector<1x16xf32>
    %222 = arith.maximumf %220, %221 : vector<1x16xf32>
    %223 = vector.broadcast %cst_54 : f32 to vector<1x16xf32>
    %224 = arith.subf %220, %223 : vector<1x16xf32>
    %225 = arith.cmpf one, %224, %224 : vector<1x16xf32>
    %226 = vector.broadcast %cst_54 : f32 to vector<1x16xf32>
    %227 = arith.addf %220, %226 : vector<1x16xf32>
    %228 = math.absf %224 : vector<1x16xf32>
    %cst_55 = arith.constant 0.000000e+00 : f32
    %229 = vector.broadcast %cst_55 : f32 to vector<1x16xf32>
    %230 = arith.subf %229, %228 : vector<1x16xf32>
    %231 = math.exp %230 : vector<1x16xf32>
    %232 = math.log1p %231 : vector<1x16xf32>
    %233 = arith.addf %222, %232 : vector<1x16xf32>
    %234 = arith.select %225, %227, %233 : vector<1x16xi1>, vector<1x16xf32>
    %235 = arith.mulf %219, %234 : vector<1x16xf32>
    %236 = vector.broadcast %213 : f32 to vector<1x16xf32>
    %237 = arith.mulf %235, %236 : vector<1x16xf32>
    %238 = arith.index_cast %202 : i32 to index
    %c0_56 = arith.constant 0 : index
    %239 = vector.load %arg16[%238, %c0_56] : memref<8x16xf32, #tpu.memory_space<vmem>>, vector<1x16xf32>
    %240 = arith.addf %239, %237 : vector<1x16xf32>
    %241 = arith.index_cast %202 : i32 to index
    %c0_57 = arith.constant 0 : index
    %242 = vector.load %arg16[%241, %c0_57] : memref<8x16xf32, #tpu.memory_space<vmem>>, vector<1x16xf32>
    tpu.vector_store %arg16[%241, %c0_57], %240 {strides = array<i32>} : memref<8x16xf32, #tpu.memory_space<vmem>>, vector<1x16xf32>,
    %c5_i32 = arith.constant 5 : i32
    %243 = arith.addi %17, %c5_i32 : i32
    %244 = arith.index_cast %243 : i32 to index
    %245 = memref.load %arg2[%244] : memref<32xi32, #tpu.memory_space<smem>>
    %246 = arith.index_cast %243 : i32 to index
    %247 = memref.load %arg3[%246] : memref<32xi32, #tpu.memory_space<smem>>
    %248 = arith.index_cast %245 : i32 to index
    %c0_58 = arith.constant 0 : index
    %249 = vector.load %arg17[%248, %c0_58] : memref<8x32xf32, #tpu.memory_space<vmem>>, vector<1x32xf32>
    %250 = arith.index_cast %247 : i32 to index
    %c0_59 = arith.constant 0 : index
    %251 = vector.load %arg18[%250, %c0_59] : memref<8x32xf32, #tpu.memory_space<vmem>>, vector<1x32xf32>
    %252 = arith.addf %249, %251 : vector<1x32xf32>
    %253 = arith.index_cast %c5_i32 : i32 to index
    %c0_60 = arith.constant 0 : index
    %254 = vector.load %arg19[%253, %c0_60] : memref<16x32xf32, #tpu.memory_space<vmem>>, vector<1x32xf32>
    %255 = arith.addf %252, %254 : vector<1x32xf32>
    %c20_i32_61 = arith.constant 20 : i32
    %256 = arith.cmpi slt, %243, %c20_i32_61 : i32
    %257 = arith.extui %256 : i1 to i32
    %258 = arith.sitofp %257 : i32 to f32
    %259 = vector.extract_strided_slice %255 {offsets = [0, 0], sizes = [1, 16], strides = [1, 1]} : vector<1x32xf32> to vector<1x16xf32>
    %260 = arith.negf %259 : vector<1x16xf32>
    %261 = math.exp %260 : vector<1x16xf32>
    %cst_62 = arith.constant 1.000000e+00 : f32
    %262 = vector.broadcast %cst_62 : f32 to vector<1x16xf32>
    %263 = arith.addf %262, %261 : vector<1x16xf32>
    %264 = arith.divf %262, %263 : vector<1x16xf32>
    %265 = vector.extract_strided_slice %255 {offsets = [0, 16], sizes = [1, 16], strides = [1, 1]} : vector<1x32xf32> to vector<1x16xf32>
    %cst_63 = arith.constant 0.000000e+00 : f32
    %266 = vector.broadcast %cst_63 : f32 to vector<1x16xf32>
    %267 = arith.maximumf %265, %266 : vector<1x16xf32>
    %268 = vector.broadcast %cst_63 : f32 to vector<1x16xf32>
    %269 = arith.subf %265, %268 : vector<1x16xf32>
    %270 = arith.cmpf one, %269, %269 : vector<1x16xf32>
    %271 = vector.broadcast %cst_63 : f32 to vector<1x16xf32>
    %272 = arith.addf %265, %271 : vector<1x16xf32>
    %273 = math.absf %269 : vector<1x16xf32>
    %cst_64 = arith.constant 0.000000e+00 : f32
    %274 = vector.broadcast %cst_64 : f32 to vector<1x16xf32>
    %275 = arith.subf %274, %273 : vector<1x16xf32>
    %276 = math.exp %275 : vector<1x16xf32>
    %277 = math.log1p %276 : vector<1x16xf32>
    %278 = arith.addf %267, %277 : vector<1x16xf32>
    %279 = arith.select %270, %272, %278 : vector<1x16xi1>, vector<1x16xf32>
    %280 = arith.mulf %264, %279 : vector<1x16xf32>
    %281 = vector.broadcast %258 : f32 to vector<1x16xf32>
    %282 = arith.mulf %280, %281 : vector<1x16xf32>
    %283 = arith.index_cast %247 : i32 to index
    %c0_65 = arith.constant 0 : index
    %284 = vector.load %arg16[%283, %c0_65] : memref<8x16xf32, #tpu.memory_space<vmem>>, vector<1x16xf32>
    %285 = arith.addf %284, %282 : vector<1x16xf32>
    %286 = arith.index_cast %247 : i32 to index
    %c0_66 = arith.constant 0 : index
    %287 = vector.load %arg16[%286, %c0_66] : memref<8x16xf32, #tpu.memory_space<vmem>>, vector<1x16xf32>
    tpu.vector_store %arg16[%286, %c0_66], %285 {strides = array<i32>} : memref<8x16xf32, #tpu.memory_space<vmem>>, vector<1x16xf32>,
    %c6_i32 = arith.constant 6 : i32
    %288 = arith.addi %17, %c6_i32 : i32
    %289 = arith.index_cast %288 : i32 to index
    %290 = memref.load %arg2[%289] : memref<32xi32, #tpu.memory_space<smem>>
    %291 = arith.index_cast %288 : i32 to index
    %292 = memref.load %arg3[%291] : memref<32xi32, #tpu.memory_space<smem>>
    %293 = arith.index_cast %290 : i32 to index
    %c0_67 = arith.constant 0 : index
    %294 = vector.load %arg17[%293, %c0_67] : memref<8x32xf32, #tpu.memory_space<vmem>>, vector<1x32xf32>
    %295 = arith.index_cast %292 : i32 to index
    %c0_68 = arith.constant 0 : index
    %296 = vector.load %arg18[%295, %c0_68] : memref<8x32xf32, #tpu.memory_space<vmem>>, vector<1x32xf32>
    %297 = arith.addf %294, %296 : vector<1x32xf32>
    %298 = arith.index_cast %c6_i32 : i32 to index
    %c0_69 = arith.constant 0 : index
    %299 = vector.load %arg19[%298, %c0_69] : memref<16x32xf32, #tpu.memory_space<vmem>>, vector<1x32xf32>
    %300 = arith.addf %297, %299 : vector<1x32xf32>
    %c20_i32_70 = arith.constant 20 : i32
    %301 = arith.cmpi slt, %288, %c20_i32_70 : i32
    %302 = arith.extui %301 : i1 to i32
    %303 = arith.sitofp %302 : i32 to f32
    %304 = vector.extract_strided_slice %300 {offsets = [0, 0], sizes = [1, 16], strides = [1, 1]} : vector<1x32xf32> to vector<1x16xf32>
    %305 = arith.negf %304 : vector<1x16xf32>
    %306 = math.exp %305 : vector<1x16xf32>
    %cst_71 = arith.constant 1.000000e+00 : f32
    %307 = vector.broadcast %cst_71 : f32 to vector<1x16xf32>
    %308 = arith.addf %307, %306 : vector<1x16xf32>
    %309 = arith.divf %307, %308 : vector<1x16xf32>
    %310 = vector.extract_strided_slice %300 {offsets = [0, 16], sizes = [1, 16], strides = [1, 1]} : vector<1x32xf32> to vector<1x16xf32>
    %cst_72 = arith.constant 0.000000e+00 : f32
    %311 = vector.broadcast %cst_72 : f32 to vector<1x16xf32>
    %312 = arith.maximumf %310, %311 : vector<1x16xf32>
    %313 = vector.broadcast %cst_72 : f32 to vector<1x16xf32>
    %314 = arith.subf %310, %313 : vector<1x16xf32>
    %315 = arith.cmpf one, %314, %314 : vector<1x16xf32>
    %316 = vector.broadcast %cst_72 : f32 to vector<1x16xf32>
    %317 = arith.addf %310, %316 : vector<1x16xf32>
    %318 = math.absf %314 : vector<1x16xf32>
    %cst_73 = arith.constant 0.000000e+00 : f32
    %319 = vector.broadcast %cst_73 : f32 to vector<1x16xf32>
    %320 = arith.subf %319, %318 : vector<1x16xf32>
    %321 = math.exp %320 : vector<1x16xf32>
    %322 = math.log1p %321 : vector<1x16xf32>
    %323 = arith.addf %312, %322 : vector<1x16xf32>
    %324 = arith.select %315, %317, %323 : vector<1x16xi1>, vector<1x16xf32>
    %325 = arith.mulf %309, %324 : vector<1x16xf32>
    %326 = vector.broadcast %303 : f32 to vector<1x16xf32>
    %327 = arith.mulf %325, %326 : vector<1x16xf32>
    %328 = arith.index_cast %292 : i32 to index
    %c0_74 = arith.constant 0 : index
    %329 = vector.load %arg16[%328, %c0_74] : memref<8x16xf32, #tpu.memory_space<vmem>>, vector<1x16xf32>
    %330 = arith.addf %329, %327 : vector<1x16xf32>
    %331 = arith.index_cast %292 : i32 to index
    %c0_75 = arith.constant 0 : index
    %332 = vector.load %arg16[%331, %c0_75] : memref<8x16xf32, #tpu.memory_space<vmem>>, vector<1x16xf32>
    tpu.vector_store %arg16[%331, %c0_75], %330 {strides = array<i32>} : memref<8x16xf32, #tpu.memory_space<vmem>>, vector<1x16xf32>,
    %c7_i32 = arith.constant 7 : i32
    %333 = arith.addi %17, %c7_i32 : i32
    %334 = arith.index_cast %333 : i32 to index
    %335 = memref.load %arg2[%334] : memref<32xi32, #tpu.memory_space<smem>>
    %336 = arith.index_cast %333 : i32 to index
    %337 = memref.load %arg3[%336] : memref<32xi32, #tpu.memory_space<smem>>
    %338 = arith.index_cast %335 : i32 to index
    %c0_76 = arith.constant 0 : index
    %339 = vector.load %arg17[%338, %c0_76] : memref<8x32xf32, #tpu.memory_space<vmem>>, vector<1x32xf32>
    %340 = arith.index_cast %337 : i32 to index
    %c0_77 = arith.constant 0 : index
    %341 = vector.load %arg18[%340, %c0_77] : memref<8x32xf32, #tpu.memory_space<vmem>>, vector<1x32xf32>
    %342 = arith.addf %339, %341 : vector<1x32xf32>
    %343 = arith.index_cast %c7_i32 : i32 to index
    %c0_78 = arith.constant 0 : index
    %344 = vector.load %arg19[%343, %c0_78] : memref<16x32xf32, #tpu.memory_space<vmem>>, vector<1x32xf32>
    %345 = arith.addf %342, %344 : vector<1x32xf32>
    %c20_i32_79 = arith.constant 20 : i32
    %346 = arith.cmpi slt, %333, %c20_i32_79 : i32
    %347 = arith.extui %346 : i1 to i32
    %348 = arith.sitofp %347 : i32 to f32
    %349 = vector.extract_strided_slice %345 {offsets = [0, 0], sizes = [1, 16], strides = [1, 1]} : vector<1x32xf32> to vector<1x16xf32>
    %350 = arith.negf %349 : vector<1x16xf32>
    %351 = math.exp %350 : vector<1x16xf32>
    %cst_80 = arith.constant 1.000000e+00 : f32
    %352 = vector.broadcast %cst_80 : f32 to vector<1x16xf32>
    %353 = arith.addf %352, %351 : vector<1x16xf32>
    %354 = arith.divf %352, %353 : vector<1x16xf32>
    %355 = vector.extract_strided_slice %345 {offsets = [0, 16], sizes = [1, 16], strides = [1, 1]} : vector<1x32xf32> to vector<1x16xf32>
    %cst_81 = arith.constant 0.000000e+00 : f32
    %356 = vector.broadcast %cst_81 : f32 to vector<1x16xf32>
    %357 = arith.maximumf %355, %356 : vector<1x16xf32>
    %358 = vector.broadcast %cst_81 : f32 to vector<1x16xf32>
    %359 = arith.subf %355, %358 : vector<1x16xf32>
    %360 = arith.cmpf one, %359, %359 : vector<1x16xf32>
    %361 = vector.broadcast %cst_81 : f32 to vector<1x16xf32>
    %362 = arith.addf %355, %361 : vector<1x16xf32>
    %363 = math.absf %359 : vector<1x16xf32>
    %cst_82 = arith.constant 0.000000e+00 : f32
    %364 = vector.broadcast %cst_82 : f32 to vector<1x16xf32>
    %365 = arith.subf %364, %363 : vector<1x16xf32>
    %366 = math.exp %365 : vector<1x16xf32>
    %367 = math.log1p %366 : vector<1x16xf32>
    %368 = arith.addf %357, %367 : vector<1x16xf32>
    %369 = arith.select %360, %362, %368 : vector<1x16xi1>, vector<1x16xf32>
    %370 = arith.mulf %354, %369 : vector<1x16xf32>
    %371 = vector.broadcast %348 : f32 to vector<1x16xf32>
    %372 = arith.mulf %370, %371 : vector<1x16xf32>
    %373 = arith.index_cast %337 : i32 to index
    %c0_83 = arith.constant 0 : index
    %374 = vector.load %arg16[%373, %c0_83] : memref<8x16xf32, #tpu.memory_space<vmem>>, vector<1x16xf32>
    %375 = arith.addf %374, %372 : vector<1x16xf32>
    %376 = arith.index_cast %337 : i32 to index
    %c0_84 = arith.constant 0 : index
    %377 = vector.load %arg16[%376, %c0_84] : memref<8x16xf32, #tpu.memory_space<vmem>>, vector<1x16xf32>
    tpu.vector_store %arg16[%376, %c0_84], %375 {strides = array<i32>} : memref<8x16xf32, #tpu.memory_space<vmem>>, vector<1x16xf32>,
    %c8_i32 = arith.constant 8 : i32
    %378 = arith.addi %17, %c8_i32 : i32
    %379 = arith.index_cast %378 : i32 to index
    %380 = memref.load %arg2[%379] : memref<32xi32, #tpu.memory_space<smem>>
    %381 = arith.index_cast %378 : i32 to index
    %382 = memref.load %arg3[%381] : memref<32xi32, #tpu.memory_space<smem>>
    %383 = arith.index_cast %380 : i32 to index
    %c0_85 = arith.constant 0 : index
    %384 = vector.load %arg17[%383, %c0_85] : memref<8x32xf32, #tpu.memory_space<vmem>>, vector<1x32xf32>
    %385 = arith.index_cast %382 : i32 to index
    %c0_86 = arith.constant 0 : index
    %386 = vector.load %arg18[%385, %c0_86] : memref<8x32xf32, #tpu.memory_space<vmem>>, vector<1x32xf32>
    %387 = arith.addf %384, %386 : vector<1x32xf32>
    %388 = arith.index_cast %c8_i32 : i32 to index
    %c0_87 = arith.constant 0 : index
    %389 = vector.load %arg19[%388, %c0_87] : memref<16x32xf32, #tpu.memory_space<vmem>>, vector<1x32xf32>
    %390 = arith.addf %387, %389 : vector<1x32xf32>
    %c20_i32_88 = arith.constant 20 : i32
    %391 = arith.cmpi slt, %378, %c20_i32_88 : i32
    %392 = arith.extui %391 : i1 to i32
    %393 = arith.sitofp %392 : i32 to f32
    %394 = vector.extract_strided_slice %390 {offsets = [0, 0], sizes = [1, 16], strides = [1, 1]} : vector<1x32xf32> to vector<1x16xf32>
    %395 = arith.negf %394 : vector<1x16xf32>
    %396 = math.exp %395 : vector<1x16xf32>
    %cst_89 = arith.constant 1.000000e+00 : f32
    %397 = vector.broadcast %cst_89 : f32 to vector<1x16xf32>
    %398 = arith.addf %397, %396 : vector<1x16xf32>
    %399 = arith.divf %397, %398 : vector<1x16xf32>
    %400 = vector.extract_strided_slice %390 {offsets = [0, 16], sizes = [1, 16], strides = [1, 1]} : vector<1x32xf32> to vector<1x16xf32>
    %cst_90 = arith.constant 0.000000e+00 : f32
    %401 = vector.broadcast %cst_90 : f32 to vector<1x16xf32>
    %402 = arith.maximumf %400, %401 : vector<1x16xf32>
    %403 = vector.broadcast %cst_90 : f32 to vector<1x16xf32>
    %404 = arith.subf %400, %403 : vector<1x16xf32>
    %405 = arith.cmpf one, %404, %404 : vector<1x16xf32>
    %406 = vector.broadcast %cst_90 : f32 to vector<1x16xf32>
    %407 = arith.addf %400, %406 : vector<1x16xf32>
    %408 = math.absf %404 : vector<1x16xf32>
    %cst_91 = arith.constant 0.000000e+00 : f32
    %409 = vector.broadcast %cst_91 : f32 to vector<1x16xf32>
    %410 = arith.subf %409, %408 : vector<1x16xf32>
    %411 = math.exp %410 : vector<1x16xf32>
    %412 = math.log1p %411 : vector<1x16xf32>
    %413 = arith.addf %402, %412 : vector<1x16xf32>
    %414 = arith.select %405, %407, %413 : vector<1x16xi1>, vector<1x16xf32>
    %415 = arith.mulf %399, %414 : vector<1x16xf32>
    %416 = vector.broadcast %393 : f32 to vector<1x16xf32>
    %417 = arith.mulf %415, %416 : vector<1x16xf32>
    %418 = arith.index_cast %382 : i32 to index
    %c0_92 = arith.constant 0 : index
    %419 = vector.load %arg16[%418, %c0_92] : memref<8x16xf32, #tpu.memory_space<vmem>>, vector<1x16xf32>
    %420 = arith.addf %419, %417 : vector<1x16xf32>
    %421 = arith.index_cast %382 : i32 to index
    %c0_93 = arith.constant 0 : index
    %422 = vector.load %arg16[%421, %c0_93] : memref<8x16xf32, #tpu.memory_space<vmem>>, vector<1x16xf32>
    tpu.vector_store %arg16[%421, %c0_93], %420 {strides = array<i32>} : memref<8x16xf32, #tpu.memory_space<vmem>>, vector<1x16xf32>,
    %c9_i32 = arith.constant 9 : i32
    %423 = arith.addi %17, %c9_i32 : i32
    %424 = arith.index_cast %423 : i32 to index
    %425 = memref.load %arg2[%424] : memref<32xi32, #tpu.memory_space<smem>>
    %426 = arith.index_cast %423 : i32 to index
    %427 = memref.load %arg3[%426] : memref<32xi32, #tpu.memory_space<smem>>
    %428 = arith.index_cast %425 : i32 to index
    %c0_94 = arith.constant 0 : index
    %429 = vector.load %arg17[%428, %c0_94] : memref<8x32xf32, #tpu.memory_space<vmem>>, vector<1x32xf32>
    %430 = arith.index_cast %427 : i32 to index
    %c0_95 = arith.constant 0 : index
    %431 = vector.load %arg18[%430, %c0_95] : memref<8x32xf32, #tpu.memory_space<vmem>>, vector<1x32xf32>
    %432 = arith.addf %429, %431 : vector<1x32xf32>
    %433 = arith.index_cast %c9_i32 : i32 to index
    %c0_96 = arith.constant 0 : index
    %434 = vector.load %arg19[%433, %c0_96] : memref<16x32xf32, #tpu.memory_space<vmem>>, vector<1x32xf32>
    %435 = arith.addf %432, %434 : vector<1x32xf32>
    %c20_i32_97 = arith.constant 20 : i32
    %436 = arith.cmpi slt, %423, %c20_i32_97 : i32
    %437 = arith.extui %436 : i1 to i32
    %438 = arith.sitofp %437 : i32 to f32
    %439 = vector.extract_strided_slice %435 {offsets = [0, 0], sizes = [1, 16], strides = [1, 1]} : vector<1x32xf32> to vector<1x16xf32>
    %440 = arith.negf %439 : vector<1x16xf32>
    %441 = math.exp %440 : vector<1x16xf32>
    %cst_98 = arith.constant 1.000000e+00 : f32
    %442 = vector.broadcast %cst_98 : f32 to vector<1x16xf32>
    %443 = arith.addf %442, %441 : vector<1x16xf32>
    %444 = arith.divf %442, %443 : vector<1x16xf32>
    %445 = vector.extract_strided_slice %435 {offsets = [0, 16], sizes = [1, 16], strides = [1, 1]} : vector<1x32xf32> to vector<1x16xf32>
    %cst_99 = arith.constant 0.000000e+00 : f32
    %446 = vector.broadcast %cst_99 : f32 to vector<1x16xf32>
    %447 = arith.maximumf %445, %446 : vector<1x16xf32>
    %448 = vector.broadcast %cst_99 : f32 to vector<1x16xf32>
    %449 = arith.subf %445, %448 : vector<1x16xf32>
    %450 = arith.cmpf one, %449, %449 : vector<1x16xf32>
    %451 = vector.broadcast %cst_99 : f32 to vector<1x16xf32>
    %452 = arith.addf %445, %451 : vector<1x16xf32>
    %453 = math.absf %449 : vector<1x16xf32>
    %cst_100 = arith.constant 0.000000e+00 : f32
    %454 = vector.broadcast %cst_100 : f32 to vector<1x16xf32>
    %455 = arith.subf %454, %453 : vector<1x16xf32>
    %456 = math.exp %455 : vector<1x16xf32>
    %457 = math.log1p %456 : vector<1x16xf32>
    %458 = arith.addf %447, %457 : vector<1x16xf32>
    %459 = arith.select %450, %452, %458 : vector<1x16xi1>, vector<1x16xf32>
    %460 = arith.mulf %444, %459 : vector<1x16xf32>
    %461 = vector.broadcast %438 : f32 to vector<1x16xf32>
    %462 = arith.mulf %460, %461 : vector<1x16xf32>
    %463 = arith.index_cast %427 : i32 to index
    %c0_101 = arith.constant 0 : index
    %464 = vector.load %arg16[%463, %c0_101] : memref<8x16xf32, #tpu.memory_space<vmem>>, vector<1x16xf32>
    %465 = arith.addf %464, %462 : vector<1x16xf32>
    %466 = arith.index_cast %427 : i32 to index
    %c0_102 = arith.constant 0 : index
    %467 = vector.load %arg16[%466, %c0_102] : memref<8x16xf32, #tpu.memory_space<vmem>>, vector<1x16xf32>
    tpu.vector_store %arg16[%466, %c0_102], %465 {strides = array<i32>} : memref<8x16xf32, #tpu.memory_space<vmem>>, vector<1x16xf32>,
    %c10_i32 = arith.constant 10 : i32
    %468 = arith.addi %17, %c10_i32 : i32
    %469 = arith.index_cast %468 : i32 to index
    %470 = memref.load %arg2[%469] : memref<32xi32, #tpu.memory_space<smem>>
    %471 = arith.index_cast %468 : i32 to index
    %472 = memref.load %arg3[%471] : memref<32xi32, #tpu.memory_space<smem>>
    %473 = arith.index_cast %470 : i32 to index
    %c0_103 = arith.constant 0 : index
    %474 = vector.load %arg17[%473, %c0_103] : memref<8x32xf32, #tpu.memory_space<vmem>>, vector<1x32xf32>
    %475 = arith.index_cast %472 : i32 to index
    %c0_104 = arith.constant 0 : index
    %476 = vector.load %arg18[%475, %c0_104] : memref<8x32xf32, #tpu.memory_space<vmem>>, vector<1x32xf32>
    %477 = arith.addf %474, %476 : vector<1x32xf32>
    %478 = arith.index_cast %c10_i32 : i32 to index
    %c0_105 = arith.constant 0 : index
    %479 = vector.load %arg19[%478, %c0_105] : memref<16x32xf32, #tpu.memory_space<vmem>>, vector<1x32xf32>
    %480 = arith.addf %477, %479 : vector<1x32xf32>
    %c20_i32_106 = arith.constant 20 : i32
    %481 = arith.cmpi slt, %468, %c20_i32_106 : i32
    %482 = arith.extui %481 : i1 to i32
    %483 = arith.sitofp %482 : i32 to f32
    %484 = vector.extract_strided_slice %480 {offsets = [0, 0], sizes = [1, 16], strides = [1, 1]} : vector<1x32xf32> to vector<1x16xf32>
    %485 = arith.negf %484 : vector<1x16xf32>
    %486 = math.exp %485 : vector<1x16xf32>
    %cst_107 = arith.constant 1.000000e+00 : f32
    %487 = vector.broadcast %cst_107 : f32 to vector<1x16xf32>
    %488 = arith.addf %487, %486 : vector<1x16xf32>
    %489 = arith.divf %487, %488 : vector<1x16xf32>
    %490 = vector.extract_strided_slice %480 {offsets = [0, 16], sizes = [1, 16], strides = [1, 1]} : vector<1x32xf32> to vector<1x16xf32>
    %cst_108 = arith.constant 0.000000e+00 : f32
    %491 = vector.broadcast %cst_108 : f32 to vector<1x16xf32>
    %492 = arith.maximumf %490, %491 : vector<1x16xf32>
    %493 = vector.broadcast %cst_108 : f32 to vector<1x16xf32>
    %494 = arith.subf %490, %493 : vector<1x16xf32>
    %495 = arith.cmpf one, %494, %494 : vector<1x16xf32>
    %496 = vector.broadcast %cst_108 : f32 to vector<1x16xf32>
    %497 = arith.addf %490, %496 : vector<1x16xf32>
    %498 = math.absf %494 : vector<1x16xf32>
    %cst_109 = arith.constant 0.000000e+00 : f32
    %499 = vector.broadcast %cst_109 : f32 to vector<1x16xf32>
    %500 = arith.subf %499, %498 : vector<1x16xf32>
    %501 = math.exp %500 : vector<1x16xf32>
    %502 = math.log1p %501 : vector<1x16xf32>
    %503 = arith.addf %492, %502 : vector<1x16xf32>
    %504 = arith.select %495, %497, %503 : vector<1x16xi1>, vector<1x16xf32>
    %505 = arith.mulf %489, %504 : vector<1x16xf32>
    %506 = vector.broadcast %483 : f32 to vector<1x16xf32>
    %507 = arith.mulf %505, %506 : vector<1x16xf32>
    %508 = arith.index_cast %472 : i32 to index
    %c0_110 = arith.constant 0 : index
    %509 = vector.load %arg16[%508, %c0_110] : memref<8x16xf32, #tpu.memory_space<vmem>>, vector<1x16xf32>
    %510 = arith.addf %509, %507 : vector<1x16xf32>
    %511 = arith.index_cast %472 : i32 to index
    %c0_111 = arith.constant 0 : index
    %512 = vector.load %arg16[%511, %c0_111] : memref<8x16xf32, #tpu.memory_space<vmem>>, vector<1x16xf32>
    tpu.vector_store %arg16[%511, %c0_111], %510 {strides = array<i32>} : memref<8x16xf32, #tpu.memory_space<vmem>>, vector<1x16xf32>,
    %c11_i32 = arith.constant 11 : i32
    %513 = arith.addi %17, %c11_i32 : i32
    %514 = arith.index_cast %513 : i32 to index
    %515 = memref.load %arg2[%514] : memref<32xi32, #tpu.memory_space<smem>>
    %516 = arith.index_cast %513 : i32 to index
    %517 = memref.load %arg3[%516] : memref<32xi32, #tpu.memory_space<smem>>
    %518 = arith.index_cast %515 : i32 to index
    %c0_112 = arith.constant 0 : index
    %519 = vector.load %arg17[%518, %c0_112] : memref<8x32xf32, #tpu.memory_space<vmem>>, vector<1x32xf32>
    %520 = arith.index_cast %517 : i32 to index
    %c0_113 = arith.constant 0 : index
    %521 = vector.load %arg18[%520, %c0_113] : memref<8x32xf32, #tpu.memory_space<vmem>>, vector<1x32xf32>
    %522 = arith.addf %519, %521 : vector<1x32xf32>
    %523 = arith.index_cast %c11_i32 : i32 to index
    %c0_114 = arith.constant 0 : index
    %524 = vector.load %arg19[%523, %c0_114] : memref<16x32xf32, #tpu.memory_space<vmem>>, vector<1x32xf32>
    %525 = arith.addf %522, %524 : vector<1x32xf32>
    %c20_i32_115 = arith.constant 20 : i32
    %526 = arith.cmpi slt, %513, %c20_i32_115 : i32
    %527 = arith.extui %526 : i1 to i32
    %528 = arith.sitofp %527 : i32 to f32
    %529 = vector.extract_strided_slice %525 {offsets = [0, 0], sizes = [1, 16], strides = [1, 1]} : vector<1x32xf32> to vector<1x16xf32>
    %530 = arith.negf %529 : vector<1x16xf32>
    %531 = math.exp %530 : vector<1x16xf32>
    %cst_116 = arith.constant 1.000000e+00 : f32
    %532 = vector.broadcast %cst_116 : f32 to vector<1x16xf32>
    %533 = arith.addf %532, %531 : vector<1x16xf32>
    %534 = arith.divf %532, %533 : vector<1x16xf32>
    %535 = vector.extract_strided_slice %525 {offsets = [0, 16], sizes = [1, 16], strides = [1, 1]} : vector<1x32xf32> to vector<1x16xf32>
    %cst_117 = arith.constant 0.000000e+00 : f32
    %536 = vector.broadcast %cst_117 : f32 to vector<1x16xf32>
    %537 = arith.maximumf %535, %536 : vector<1x16xf32>
    %538 = vector.broadcast %cst_117 : f32 to vector<1x16xf32>
    %539 = arith.subf %535, %538 : vector<1x16xf32>
    %540 = arith.cmpf one, %539, %539 : vector<1x16xf32>
    %541 = vector.broadcast %cst_117 : f32 to vector<1x16xf32>
    %542 = arith.addf %535, %541 : vector<1x16xf32>
    %543 = math.absf %539 : vector<1x16xf32>
    %cst_118 = arith.constant 0.000000e+00 : f32
    %544 = vector.broadcast %cst_118 : f32 to vector<1x16xf32>
    %545 = arith.subf %544, %543 : vector<1x16xf32>
    %546 = math.exp %545 : vector<1x16xf32>
    %547 = math.log1p %546 : vector<1x16xf32>
    %548 = arith.addf %537, %547 : vector<1x16xf32>
    %549 = arith.select %540, %542, %548 : vector<1x16xi1>, vector<1x16xf32>
    %550 = arith.mulf %534, %549 : vector<1x16xf32>
    %551 = vector.broadcast %528 : f32 to vector<1x16xf32>
    %552 = arith.mulf %550, %551 : vector<1x16xf32>
    %553 = arith.index_cast %517 : i32 to index
    %c0_119 = arith.constant 0 : index
    %554 = vector.load %arg16[%553, %c0_119] : memref<8x16xf32, #tpu.memory_space<vmem>>, vector<1x16xf32>
    %555 = arith.addf %554, %552 : vector<1x16xf32>
    %556 = arith.index_cast %517 : i32 to index
    %c0_120 = arith.constant 0 : index
    %557 = vector.load %arg16[%556, %c0_120] : memref<8x16xf32, #tpu.memory_space<vmem>>, vector<1x16xf32>
    tpu.vector_store %arg16[%556, %c0_120], %555 {strides = array<i32>} : memref<8x16xf32, #tpu.memory_space<vmem>>, vector<1x16xf32>,
    %c12_i32 = arith.constant 12 : i32
    %558 = arith.addi %17, %c12_i32 : i32
    %559 = arith.index_cast %558 : i32 to index
    %560 = memref.load %arg2[%559] : memref<32xi32, #tpu.memory_space<smem>>
    %561 = arith.index_cast %558 : i32 to index
    %562 = memref.load %arg3[%561] : memref<32xi32, #tpu.memory_space<smem>>
    %563 = arith.index_cast %560 : i32 to index
    %c0_121 = arith.constant 0 : index
    %564 = vector.load %arg17[%563, %c0_121] : memref<8x32xf32, #tpu.memory_space<vmem>>, vector<1x32xf32>
    %565 = arith.index_cast %562 : i32 to index
    %c0_122 = arith.constant 0 : index
    %566 = vector.load %arg18[%565, %c0_122] : memref<8x32xf32, #tpu.memory_space<vmem>>, vector<1x32xf32>
    %567 = arith.addf %564, %566 : vector<1x32xf32>
    %568 = arith.index_cast %c12_i32 : i32 to index
    %c0_123 = arith.constant 0 : index
    %569 = vector.load %arg19[%568, %c0_123] : memref<16x32xf32, #tpu.memory_space<vmem>>, vector<1x32xf32>
    %570 = arith.addf %567, %569 : vector<1x32xf32>
    %c20_i32_124 = arith.constant 20 : i32
    %571 = arith.cmpi slt, %558, %c20_i32_124 : i32
    %572 = arith.extui %571 : i1 to i32
    %573 = arith.sitofp %572 : i32 to f32
    %574 = vector.extract_strided_slice %570 {offsets = [0, 0], sizes = [1, 16], strides = [1, 1]} : vector<1x32xf32> to vector<1x16xf32>
    %575 = arith.negf %574 : vector<1x16xf32>
    %576 = math.exp %575 : vector<1x16xf32>
    %cst_125 = arith.constant 1.000000e+00 : f32
    %577 = vector.broadcast %cst_125 : f32 to vector<1x16xf32>
    %578 = arith.addf %577, %576 : vector<1x16xf32>
    %579 = arith.divf %577, %578 : vector<1x16xf32>
    %580 = vector.extract_strided_slice %570 {offsets = [0, 16], sizes = [1, 16], strides = [1, 1]} : vector<1x32xf32> to vector<1x16xf32>
    %cst_126 = arith.constant 0.000000e+00 : f32
    %581 = vector.broadcast %cst_126 : f32 to vector<1x16xf32>
    %582 = arith.maximumf %580, %581 : vector<1x16xf32>
    %583 = vector.broadcast %cst_126 : f32 to vector<1x16xf32>
    %584 = arith.subf %580, %583 : vector<1x16xf32>
    %585 = arith.cmpf one, %584, %584 : vector<1x16xf32>
    %586 = vector.broadcast %cst_126 : f32 to vector<1x16xf32>
    %587 = arith.addf %580, %586 : vector<1x16xf32>
    %588 = math.absf %584 : vector<1x16xf32>
    %cst_127 = arith.constant 0.000000e+00 : f32
    %589 = vector.broadcast %cst_127 : f32 to vector<1x16xf32>
    %590 = arith.subf %589, %588 : vector<1x16xf32>
    %591 = math.exp %590 : vector<1x16xf32>
    %592 = math.log1p %591 : vector<1x16xf32>
    %593 = arith.addf %582, %592 : vector<1x16xf32>
    %594 = arith.select %585, %587, %593 : vector<1x16xi1>, vector<1x16xf32>
    %595 = arith.mulf %579, %594 : vector<1x16xf32>
    %596 = vector.broadcast %573 : f32 to vector<1x16xf32>
    %597 = arith.mulf %595, %596 : vector<1x16xf32>
    %598 = arith.index_cast %562 : i32 to index
    %c0_128 = arith.constant 0 : index
    %599 = vector.load %arg16[%598, %c0_128] : memref<8x16xf32, #tpu.memory_space<vmem>>, vector<1x16xf32>
    %600 = arith.addf %599, %597 : vector<1x16xf32>
    %601 = arith.index_cast %562 : i32 to index
    %c0_129 = arith.constant 0 : index
    %602 = vector.load %arg16[%601, %c0_129] : memref<8x16xf32, #tpu.memory_space<vmem>>, vector<1x16xf32>
    tpu.vector_store %arg16[%601, %c0_129], %600 {strides = array<i32>} : memref<8x16xf32, #tpu.memory_space<vmem>>, vector<1x16xf32>,
    %c13_i32 = arith.constant 13 : i32
    %603 = arith.addi %17, %c13_i32 : i32
    %604 = arith.index_cast %603 : i32 to index
    %605 = memref.load %arg2[%604] : memref<32xi32, #tpu.memory_space<smem>>
    %606 = arith.index_cast %603 : i32 to index
    %607 = memref.load %arg3[%606] : memref<32xi32, #tpu.memory_space<smem>>
    %608 = arith.index_cast %605 : i32 to index
    %c0_130 = arith.constant 0 : index
    %609 = vector.load %arg17[%608, %c0_130] : memref<8x32xf32, #tpu.memory_space<vmem>>, vector<1x32xf32>
    %610 = arith.index_cast %607 : i32 to index
    %c0_131 = arith.constant 0 : index
    %611 = vector.load %arg18[%610, %c0_131] : memref<8x32xf32, #tpu.memory_space<vmem>>, vector<1x32xf32>
    %612 = arith.addf %609, %611 : vector<1x32xf32>
    %613 = arith.index_cast %c13_i32 : i32 to index
    %c0_132 = arith.constant 0 : index
    %614 = vector.load %arg19[%613, %c0_132] : memref<16x32xf32, #tpu.memory_space<vmem>>, vector<1x32xf32>
    %615 = arith.addf %612, %614 : vector<1x32xf32>
    %c20_i32_133 = arith.constant 20 : i32
    %616 = arith.cmpi slt, %603, %c20_i32_133 : i32
    %617 = arith.extui %616 : i1 to i32
    %618 = arith.sitofp %617 : i32 to f32
    %619 = vector.extract_strided_slice %615 {offsets = [0, 0], sizes = [1, 16], strides = [1, 1]} : vector<1x32xf32> to vector<1x16xf32>
    %620 = arith.negf %619 : vector<1x16xf32>
    %621 = math.exp %620 : vector<1x16xf32>
    %cst_134 = arith.constant 1.000000e+00 : f32
    %622 = vector.broadcast %cst_134 : f32 to vector<1x16xf32>
    %623 = arith.addf %622, %621 : vector<1x16xf32>
    %624 = arith.divf %622, %623 : vector<1x16xf32>
    %625 = vector.extract_strided_slice %615 {offsets = [0, 16], sizes = [1, 16], strides = [1, 1]} : vector<1x32xf32> to vector<1x16xf32>
    %cst_135 = arith.constant 0.000000e+00 : f32
    %626 = vector.broadcast %cst_135 : f32 to vector<1x16xf32>
    %627 = arith.maximumf %625, %626 : vector<1x16xf32>
    %628 = vector.broadcast %cst_135 : f32 to vector<1x16xf32>
    %629 = arith.subf %625, %628 : vector<1x16xf32>
    %630 = arith.cmpf one, %629, %629 : vector<1x16xf32>
    %631 = vector.broadcast %cst_135 : f32 to vector<1x16xf32>
    %632 = arith.addf %625, %631 : vector<1x16xf32>
    %633 = math.absf %629 : vector<1x16xf32>
    %cst_136 = arith.constant 0.000000e+00 : f32
    %634 = vector.broadcast %cst_136 : f32 to vector<1x16xf32>
    %635 = arith.subf %634, %633 : vector<1x16xf32>
    %636 = math.exp %635 : vector<1x16xf32>
    %637 = math.log1p %636 : vector<1x16xf32>
    %638 = arith.addf %627, %637 : vector<1x16xf32>
    %639 = arith.select %630, %632, %638 : vector<1x16xi1>, vector<1x16xf32>
    %640 = arith.mulf %624, %639 : vector<1x16xf32>
    %641 = vector.broadcast %618 : f32 to vector<1x16xf32>
    %642 = arith.mulf %640, %641 : vector<1x16xf32>
    %643 = arith.index_cast %607 : i32 to index
    %c0_137 = arith.constant 0 : index
    %644 = vector.load %arg16[%643, %c0_137] : memref<8x16xf32, #tpu.memory_space<vmem>>, vector<1x16xf32>
    %645 = arith.addf %644, %642 : vector<1x16xf32>
    %646 = arith.index_cast %607 : i32 to index
    %c0_138 = arith.constant 0 : index
    %647 = vector.load %arg16[%646, %c0_138] : memref<8x16xf32, #tpu.memory_space<vmem>>, vector<1x16xf32>
    tpu.vector_store %arg16[%646, %c0_138], %645 {strides = array<i32>} : memref<8x16xf32, #tpu.memory_space<vmem>>, vector<1x16xf32>,
    %c14_i32 = arith.constant 14 : i32
    %648 = arith.addi %17, %c14_i32 : i32
    %649 = arith.index_cast %648 : i32 to index
    %650 = memref.load %arg2[%649] : memref<32xi32, #tpu.memory_space<smem>>
    %651 = arith.index_cast %648 : i32 to index
    %652 = memref.load %arg3[%651] : memref<32xi32, #tpu.memory_space<smem>>
    %653 = arith.index_cast %650 : i32 to index
    %c0_139 = arith.constant 0 : index
    %654 = vector.load %arg17[%653, %c0_139] : memref<8x32xf32, #tpu.memory_space<vmem>>, vector<1x32xf32>
    %655 = arith.index_cast %652 : i32 to index
    %c0_140 = arith.constant 0 : index
    %656 = vector.load %arg18[%655, %c0_140] : memref<8x32xf32, #tpu.memory_space<vmem>>, vector<1x32xf32>
    %657 = arith.addf %654, %656 : vector<1x32xf32>
    %658 = arith.index_cast %c14_i32 : i32 to index
    %c0_141 = arith.constant 0 : index
    %659 = vector.load %arg19[%658, %c0_141] : memref<16x32xf32, #tpu.memory_space<vmem>>, vector<1x32xf32>
    %660 = arith.addf %657, %659 : vector<1x32xf32>
    %c20_i32_142 = arith.constant 20 : i32
    %661 = arith.cmpi slt, %648, %c20_i32_142 : i32
    %662 = arith.extui %661 : i1 to i32
    %663 = arith.sitofp %662 : i32 to f32
    %664 = vector.extract_strided_slice %660 {offsets = [0, 0], sizes = [1, 16], strides = [1, 1]} : vector<1x32xf32> to vector<1x16xf32>
    %665 = arith.negf %664 : vector<1x16xf32>
    %666 = math.exp %665 : vector<1x16xf32>
    %cst_143 = arith.constant 1.000000e+00 : f32
    %667 = vector.broadcast %cst_143 : f32 to vector<1x16xf32>
    %668 = arith.addf %667, %666 : vector<1x16xf32>
    %669 = arith.divf %667, %668 : vector<1x16xf32>
    %670 = vector.extract_strided_slice %660 {offsets = [0, 16], sizes = [1, 16], strides = [1, 1]} : vector<1x32xf32> to vector<1x16xf32>
    %cst_144 = arith.constant 0.000000e+00 : f32
    %671 = vector.broadcast %cst_144 : f32 to vector<1x16xf32>
    %672 = arith.maximumf %670, %671 : vector<1x16xf32>
    %673 = vector.broadcast %cst_144 : f32 to vector<1x16xf32>
    %674 = arith.subf %670, %673 : vector<1x16xf32>
    %675 = arith.cmpf one, %674, %674 : vector<1x16xf32>
    %676 = vector.broadcast %cst_144 : f32 to vector<1x16xf32>
    %677 = arith.addf %670, %676 : vector<1x16xf32>
    %678 = math.absf %674 : vector<1x16xf32>
    %cst_145 = arith.constant 0.000000e+00 : f32
    %679 = vector.broadcast %cst_145 : f32 to vector<1x16xf32>
    %680 = arith.subf %679, %678 : vector<1x16xf32>
    %681 = math.exp %680 : vector<1x16xf32>
    %682 = math.log1p %681 : vector<1x16xf32>
    %683 = arith.addf %672, %682 : vector<1x16xf32>
    %684 = arith.select %675, %677, %683 : vector<1x16xi1>, vector<1x16xf32>
    %685 = arith.mulf %669, %684 : vector<1x16xf32>
    %686 = vector.broadcast %663 : f32 to vector<1x16xf32>
    %687 = arith.mulf %685, %686 : vector<1x16xf32>
    %688 = arith.index_cast %652 : i32 to index
    %c0_146 = arith.constant 0 : index
    %689 = vector.load %arg16[%688, %c0_146] : memref<8x16xf32, #tpu.memory_space<vmem>>, vector<1x16xf32>
    %690 = arith.addf %689, %687 : vector<1x16xf32>
    %691 = arith.index_cast %652 : i32 to index
    %c0_147 = arith.constant 0 : index
    %692 = vector.load %arg16[%691, %c0_147] : memref<8x16xf32, #tpu.memory_space<vmem>>, vector<1x16xf32>
    tpu.vector_store %arg16[%691, %c0_147], %690 {strides = array<i32>} : memref<8x16xf32, #tpu.memory_space<vmem>>, vector<1x16xf32>,
    %c15_i32 = arith.constant 15 : i32
    %693 = arith.addi %17, %c15_i32 : i32
    %694 = arith.index_cast %693 : i32 to index
    %695 = memref.load %arg2[%694] : memref<32xi32, #tpu.memory_space<smem>>
    %696 = arith.index_cast %693 : i32 to index
    %697 = memref.load %arg3[%696] : memref<32xi32, #tpu.memory_space<smem>>
    %698 = arith.index_cast %695 : i32 to index
    %c0_148 = arith.constant 0 : index
    %699 = vector.load %arg17[%698, %c0_148] : memref<8x32xf32, #tpu.memory_space<vmem>>, vector<1x32xf32>
    %700 = arith.index_cast %697 : i32 to index
    %c0_149 = arith.constant 0 : index
    %701 = vector.load %arg18[%700, %c0_149] : memref<8x32xf32, #tpu.memory_space<vmem>>, vector<1x32xf32>
    %702 = arith.addf %699, %701 : vector<1x32xf32>
    %703 = arith.index_cast %c15_i32 : i32 to index
    %c0_150 = arith.constant 0 : index
    %704 = vector.load %arg19[%703, %c0_150] : memref<16x32xf32, #tpu.memory_space<vmem>>, vector<1x32xf32>
    %705 = arith.addf %702, %704 : vector<1x32xf32>
    %c20_i32_151 = arith.constant 20 : i32
    %706 = arith.cmpi slt, %693, %c20_i32_151 : i32
    %707 = arith.extui %706 : i1 to i32
    %708 = arith.sitofp %707 : i32 to f32
    %709 = vector.extract_strided_slice %705 {offsets = [0, 0], sizes = [1, 16], strides = [1, 1]} : vector<1x32xf32> to vector<1x16xf32>
    %710 = arith.negf %709 : vector<1x16xf32>
    %711 = math.exp %710 : vector<1x16xf32>
    %cst_152 = arith.constant 1.000000e+00 : f32
    %712 = vector.broadcast %cst_152 : f32 to vector<1x16xf32>
    %713 = arith.addf %712, %711 : vector<1x16xf32>
    %714 = arith.divf %712, %713 : vector<1x16xf32>
    %715 = vector.extract_strided_slice %705 {offsets = [0, 16], sizes = [1, 16], strides = [1, 1]} : vector<1x32xf32> to vector<1x16xf32>
    %cst_153 = arith.constant 0.000000e+00 : f32
    %716 = vector.broadcast %cst_153 : f32 to vector<1x16xf32>
    %717 = arith.maximumf %715, %716 : vector<1x16xf32>
    %718 = vector.broadcast %cst_153 : f32 to vector<1x16xf32>
    %719 = arith.subf %715, %718 : vector<1x16xf32>
    %720 = arith.cmpf one, %719, %719 : vector<1x16xf32>
    %721 = vector.broadcast %cst_153 : f32 to vector<1x16xf32>
    %722 = arith.addf %715, %721 : vector<1x16xf32>
    %723 = math.absf %719 : vector<1x16xf32>
    %cst_154 = arith.constant 0.000000e+00 : f32
    %724 = vector.broadcast %cst_154 : f32 to vector<1x16xf32>
    %725 = arith.subf %724, %723 : vector<1x16xf32>
    %726 = math.exp %725 : vector<1x16xf32>
    %727 = math.log1p %726 : vector<1x16xf32>
    %728 = arith.addf %717, %727 : vector<1x16xf32>
    %729 = arith.select %720, %722, %728 : vector<1x16xi1>, vector<1x16xf32>
    %730 = arith.mulf %714, %729 : vector<1x16xf32>
    %731 = vector.broadcast %708 : f32 to vector<1x16xf32>
    %732 = arith.mulf %730, %731 : vector<1x16xf32>
    %733 = arith.index_cast %697 : i32 to index
    %c0_155 = arith.constant 0 : index
    %734 = vector.load %arg16[%733, %c0_155] : memref<8x16xf32, #tpu.memory_space<vmem>>, vector<1x16xf32>
    %735 = arith.addf %734, %732 : vector<1x16xf32>
    %736 = arith.index_cast %697 : i32 to index
    %c0_156 = arith.constant 0 : index
    %737 = vector.load %arg16[%736, %c0_156] : memref<8x16xf32, #tpu.memory_space<vmem>>, vector<1x16xf32>
    tpu.vector_store %arg16[%736, %c0_156], %735 {strides = array<i32>} : memref<8x16xf32, #tpu.memory_space<vmem>>, vector<1x16xf32>,
    %c16_i32_157 = arith.constant 16 : i32
    %c2_i32_158 = arith.constant 2 : i32
    %738 = arith.cmpi eq, %arg0, %c2_i32_158 : i32
    %c1_i32_159 = arith.constant 1 : i32
    %739 = arith.cmpi eq, %arg1, %c1_i32_159 : i32
    %740 = arith.andi %738, %739 : i1
    %741 = arith.extui %740 : i1 to i32
    %c0_i32_160 = arith.constant 0 : i32
    %742 = arith.cmpi ne, %741, %c0_i32_160 : i32
    scf.if %742 {
      %c0_161 = arith.constant 0 : index
      %c0_162 = arith.constant 0 : index
      %743 = vector.load %arg16[%c0_161, %c0_162] : memref<8x16xf32, #tpu.memory_space<vmem>>, vector<8x16xf32>
      %cst_163 = arith.constant dense<0.000000e+00> : vector<16xf32>
      %744 = vector.multi_reduction <add>, %743, %cst_163 [0] : vector<8x16xf32> to vector<16xf32>
      %745 = vector.shape_cast %744 : vector<16xf32> to vector<1x16xf32>
      %cst_164 = arith.constant 1.250000e-01 : f32
      %746 = vector.broadcast %cst_164 : f32 to vector<1x16xf32>
      %747 = arith.mulf %745, %746 : vector<1x16xf32>
      %c0_165 = arith.constant 0 : index
      %c0_166 = arith.constant 0 : index
      %748 = vector.load %arg9[%c0_165, %c0_166] : memref<16x32xf32, #tpu.memory_space<vmem>>, vector<16x32xf32>
      %cst_167 = arith.constant dense<0.000000e+00> : vector<1x32xf32>
      %749 = tpu.matmul %747, %748, %cst_167 {dimension_numbers = #tpu.dot_dimension_numbers<[1], [0], [0], [1], [0, 0, 1, 1], [], []>} : vector<1x16xf32>, vector<16x32xf32>, vector<1x32xf32> -> vector<1x32xf32>
      %c0_168 = arith.constant 0 : index
      %c0_169 = arith.constant 0 : index
      %750 = vector.load %arg10[%c0_168, %c0_169] : memref<1x32xf32, #tpu.memory_space<vmem>>, vector<1x32xf32>
      %751 = arith.addf %749, %750 : vector<1x32xf32>
      %cst_170 = arith.constant 0.000000e+00 : f32
      %752 = vector.broadcast %cst_170 : f32 to vector<1x32xf32>
      %753 = arith.maximumf %751, %752 : vector<1x32xf32>
      %754 = vector.broadcast %cst_170 : f32 to vector<1x32xf32>
      %755 = arith.subf %751, %754 : vector<1x32xf32>
      %756 = arith.cmpf one, %755, %755 : vector<1x32xf32>
      %757 = vector.broadcast %cst_170 : f32 to vector<1x32xf32>
      %758 = arith.addf %751, %757 : vector<1x32xf32>
      %759 = math.absf %755 : vector<1x32xf32>
      %cst_171 = arith.constant 0.000000e+00 : f32
      %760 = vector.broadcast %cst_171 : f32 to vector<1x32xf32>
      %761 = arith.subf %760, %759 : vector<1x32xf32>
      %762 = math.exp %761 : vector<1x32xf32>
      %763 = math.log1p %762 : vector<1x32xf32>
      %764 = arith.addf %753, %763 : vector<1x32xf32>
      %765 = arith.select %756, %758, %764 : vector<1x32xi1>, vector<1x32xf32>
      %c0_172 = arith.constant 0 : index
      %c0_173 = arith.constant 0 : index
      %766 = vector.load %arg11[%c0_172, %c0_173] : memref<32x16xf32, #tpu.memory_space<vmem>>, vector<32x16xf32>
      %cst_174 = arith.constant dense<0.000000e+00> : vector<1x16xf32>
      %767 = tpu.matmul %765, %766, %cst_174 {dimension_numbers = #tpu.dot_dimension_numbers<[1], [0], [0], [1], [0, 0, 1, 1], [], []>} : vector<1x32xf32>, vector<32x16xf32>, vector<1x16xf32> -> vector<1x16xf32>
      %c0_175 = arith.constant 0 : index
      %c0_176 = arith.constant 0 : index
      %768 = vector.load %arg12[%c0_175, %c0_176] : memref<1x16xf32, #tpu.memory_space<vmem>>, vector<1x16xf32>
      %769 = arith.addf %767, %768 : vector<1x16xf32>
      %cst_177 = arith.constant 0.000000e+00 : f32
      %770 = vector.broadcast %cst_177 : f32 to vector<1x16xf32>
      %771 = arith.maximumf %769, %770 : vector<1x16xf32>
      %772 = vector.broadcast %cst_177 : f32 to vector<1x16xf32>
      %773 = arith.subf %769, %772 : vector<1x16xf32>
      %774 = arith.cmpf one, %773, %773 : vector<1x16xf32>
      %775 = vector.broadcast %cst_177 : f32 to vector<1x16xf32>
      %776 = arith.addf %769, %775 : vector<1x16xf32>
      %777 = math.absf %773 : vector<1x16xf32>
      %cst_178 = arith.constant 0.000000e+00 : f32
      %778 = vector.broadcast %cst_178 : f32 to vector<1x16xf32>
      %779 = arith.subf %778, %777 : vector<1x16xf32>
      %780 = math.exp %779 : vector<1x16xf32>
      %781 = math.log1p %780 : vector<1x16xf32>
      %782 = arith.addf %771, %781 : vector<1x16xf32>
      %783 = arith.select %774, %776, %782 : vector<1x16xi1>, vector<1x16xf32>
      %c0_179 = arith.constant 0 : index
      %c0_180 = arith.constant 0 : index
      %784 = vector.load %arg13[%c0_179, %c0_180] : memref<16x1xf32, #tpu.memory_space<vmem>>, vector<16x1xf32>
      %cst_181 = arith.constant dense<0.000000e+00> : vector<1x1xf32>
      %785 = tpu.matmul %783, %784, %cst_181 {dimension_numbers = #tpu.dot_dimension_numbers<[1], [0], [0], [1], [0, 0, 1, 1], [], []>} : vector<1x16xf32>, vector<16x1xf32>, vector<1x1xf32> -> vector<1x1xf32>
      %c0_182 = arith.constant 0 : index
      %c0_183 = arith.constant 0 : index
      %786 = vector.load %arg14[%c0_182, %c0_183] : memref<1x1xf32, #tpu.memory_space<vmem>>, vector<1x1xf32>
      %787 = arith.addf %785, %786 : vector<1x1xf32>
      %c0_184 = arith.constant 0 : index
      %c0_185 = arith.constant 0 : index
      %788 = vector.load %arg15[%c0_184, %c0_185] : memref<1x1xf32, #tpu.memory_space<vmem>>, vector<1x1xf32>
      tpu.vector_store %arg15[%c0_184, %c0_185], %787 {strides = array<i32>} : memref<1x1xf32, #tpu.memory_space<vmem>>, vector<1x1xf32>,
    } else {
    }
    return
  }
  func.func @transform_0(%arg0: i32, %arg1: i32, %arg2: memref<32xi32, #tpu.memory_space<smem>>, %arg3: memref<32xi32, #tpu.memory_space<smem>>) -> (i32, i32) {
    %c0_i32 = arith.constant 0 : i32
    %c0_i32_0 = arith.constant 0 : i32
    %c0_i32_1 = arith.constant 0 : i32
    return %c0_i32, %c0_i32_0 : i32, i32
  }
  func.func @transform_1(%arg0: i32, %arg1: i32, %arg2: memref<32xi32, #tpu.memory_space<smem>>, %arg3: memref<32xi32, #tpu.memory_space<smem>>) -> (i32, i32) {
    %c0_i32 = arith.constant 0 : i32
    %c0_i32_0 = arith.constant 0 : i32
    return %arg1, %c0_i32 : i32, i32
  }
  func.func @transform_2(%arg0: i32, %arg1: i32, %arg2: memref<32xi32, #tpu.memory_space<smem>>, %arg3: memref<32xi32, #tpu.memory_space<smem>>) -> (i32, i32, i32) {
    %c0_i32 = arith.constant 0 : i32
    %c0_i32_0 = arith.constant 0 : i32
    %c0_i32_1 = arith.constant 0 : i32
    return %arg0, %c0_i32, %c0_i32_0 : i32, i32, i32
  }
  func.func @transform_3(%arg0: i32, %arg1: i32, %arg2: memref<32xi32, #tpu.memory_space<smem>>, %arg3: memref<32xi32, #tpu.memory_space<smem>>) -> (i32, i32, i32) {
    %c0_i32 = arith.constant 0 : i32
    %c0_i32_0 = arith.constant 0 : i32
    %c0_i32_1 = arith.constant 0 : i32
    return %arg0, %c0_i32, %c0_i32_0 : i32, i32, i32
  }
  func.func @transform_4(%arg0: i32, %arg1: i32, %arg2: memref<32xi32, #tpu.memory_space<smem>>, %arg3: memref<32xi32, #tpu.memory_space<smem>>) -> (i32, i32, i32) {
    %c0_i32 = arith.constant 0 : i32
    %c0_i32_0 = arith.constant 0 : i32
    %c0_i32_1 = arith.constant 0 : i32
    return %arg0, %c0_i32, %c0_i32_0 : i32, i32, i32
  }
  func.func @transform_5(%arg0: i32, %arg1: i32, %arg2: memref<32xi32, #tpu.memory_space<smem>>, %arg3: memref<32xi32, #tpu.memory_space<smem>>) -> (i32, i32) {
    %c0_i32 = arith.constant 0 : i32
    %c0_i32_0 = arith.constant 0 : i32
    %c0_i32_1 = arith.constant 0 : i32
    return %c0_i32, %c0_i32_0 : i32, i32
  }
  func.func @transform_6(%arg0: i32, %arg1: i32, %arg2: memref<32xi32, #tpu.memory_space<smem>>, %arg3: memref<32xi32, #tpu.memory_space<smem>>) -> (i32, i32) {
    %c0_i32 = arith.constant 0 : i32
    %c0_i32_0 = arith.constant 0 : i32
    %c0_i32_1 = arith.constant 0 : i32
    return %c0_i32, %c0_i32_0 : i32, i32
  }
  func.func @transform_7(%arg0: i32, %arg1: i32, %arg2: memref<32xi32, #tpu.memory_space<smem>>, %arg3: memref<32xi32, #tpu.memory_space<smem>>) -> (i32, i32) {
    %c0_i32 = arith.constant 0 : i32
    %c0_i32_0 = arith.constant 0 : i32
    %c0_i32_1 = arith.constant 0 : i32
    return %c0_i32, %c0_i32_0 : i32, i32
  }
  func.func @transform_8(%arg0: i32, %arg1: i32, %arg2: memref<32xi32, #tpu.memory_space<smem>>, %arg3: memref<32xi32, #tpu.memory_space<smem>>) -> (i32, i32) {
    %c0_i32 = arith.constant 0 : i32
    %c0_i32_0 = arith.constant 0 : i32
    %c0_i32_1 = arith.constant 0 : i32
    return %c0_i32, %c0_i32_0 : i32, i32
  }
  func.func @transform_9(%arg0: i32, %arg1: i32, %arg2: memref<32xi32, #tpu.memory_space<smem>>, %arg3: memref<32xi32, #tpu.memory_space<smem>>) -> (i32, i32) {
    %c0_i32 = arith.constant 0 : i32
    %c0_i32_0 = arith.constant 0 : i32
    %c0_i32_1 = arith.constant 0 : i32
    return %c0_i32, %c0_i32_0 : i32, i32
  }
  func.func @transform_10(%arg0: i32, %arg1: i32, %arg2: memref<32xi32, #tpu.memory_space<smem>>, %arg3: memref<32xi32, #tpu.memory_space<smem>>) -> (i32, i32) {
    %c0_i32 = arith.constant 0 : i32
    %c0_i32_0 = arith.constant 0 : i32
    %c0_i32_1 = arith.constant 0 : i32
    return %c0_i32, %c0_i32_0 : i32, i32
  }
  func.func @transform_11(%arg0: i32, %arg1: i32, %arg2: memref<32xi32, #tpu.memory_space<smem>>, %arg3: memref<32xi32, #tpu.memory_space<smem>>) -> (i32, i32) {
    %c0_i32 = arith.constant 0 : i32
    %c0_i32_0 = arith.constant 0 : i32
    %c0_i32_1 = arith.constant 0 : i32
    return %c0_i32, %c0_i32_0 : i32, i32
  }
}

</mosaic_0001>

<bundles_post_ra>
// kernel: net_forward.1
= control target key start
LH: loop header
LB: loop body
LE: loop exit
PB: predicated region body
PF: predicated region fallthrough
CT: control target
= control target key end

     0   :  { %s2994_s0 = inlined_call_operand.vmem [shape: s32[32], index: 0, kind: input, shape index: {}]   ;;  %s2995_s2 = inlined_call_operand.vmem [shape: f32[8,16], index: 2, kind: input, shape index: {}]   ;;  %s2996_s3 = inlined_call_operand.vmem [shape: f32[32,10], index: 3, kind: input, shape index: {}]   ;;  %s2997_s4 = inlined_call_operand.vmem [shape: f32[3,16,64], index: 4, kind: input, shape index: {}]   ;;  %s2998_s5 = inlined_call_operand.vmem [shape: f32[3,10,32], index: 5, kind: input, shape index: {}]   ;;  %s2999_s6 = inlined_call_operand.vmem [shape: f32[3,1,32], index: 6, kind: input, shape index: {}]   ;;  %s3000_s7 = inlined_call_operand.vmem [shape: f32[16,32], index: 7, kind: input, shape index: {}]   ;;  %s3001_s8 = inlined_call_operand.vmem [shape: f32[1,32], index: 8, kind: input, shape index: {}]   ;;  %s3002_s9 = inlined_call_operand.vmem [shape: f32[32,16], index: 9, kind: input, shape index: {}]   ;;  %s3003_s10 = inlined_call_operand.vmem [shape: f32[1,16], index: 10, kind: input, shape index: {}]   ;;  %s3004_s11 = inlined_call_operand.vmem [shape: f32[16,1], index: 11, kind: input, shape index: {}]   ;;  %s3005_s13 = inlined_call_operand.hbm [shape: f32[1,1], index: 13, kind: output, shape index: {}]   ;;  %s3006_s1 = inlined_call_operand.vmem [shape: s32[32], index: 1, kind: input, shape index: {}]   ;;  %s3007_s12 = inlined_call_operand.<no memory space> [shape: f32[1,1], index: 12, kind: input, shape index: {}]  }
   0x1   :  { %3028 = sst [smem:[#allocation33_spill]] %s2995_s2  ;;  %s18_s27 = sshll.u32 %s2994_s0, 4  ;;  %v26_v0 = vstv %s3007_s12  ;;  %s19_s27 = int_to_ptr.vmem [resolvable:$true] %s18_s27 }
   0x2   :  { %3029 = sst [smem:[#allocation34_spill]] %s2996_s3  ;;  %s22_s30 = sshll.u32 %s3006_s1, 4  ;;  %27 = vst [vmem:[#allocation9] sm:$0x1] %v26_v0  ;;  %s23_s30 = int_to_ptr.vmem [resolvable:$true] %s22_s30 }
   0x3   :  { %3030 = sst [smem:[#allocation35_spill]] %s2997_s4  ;;  %s2133_s16 = scalar_lea.vmem %s19_s27, 16 }
   0x4   :  { %3031 = sst [smem:[#allocation36_spill]] %s2998_s5  ;;  %p2134_p0 = scmp.ne.s32.totalorder %s19_s27, %s2133_s16 }
   0x5   :  { %3032 = sst [smem:[#allocation37_spill]] %s2999_s6  ;;  %p2138_p1 = scmp.lt.s32.totalorder %s19_s27, %s19_s27 }
   0x6   :  { %3033 = sst [smem:[#allocation38_spill]] %s3000_s7  ;;  %p2139_p2 = scmp.lt.s32.totalorder %s2133_s16, %s2133_s16 }
   0x7   :  { %3034 = sst [smem:[#allocation39_spill]] %s3001_s8 }
   0x8   :  { %3035 = sst [smem:[#allocation40_spill]] %s3002_s9  ;;  %p2140_p3 = por %p2139_p2, %p2138_p1 }
   0x9   :  { %3036 = sst [smem:[#allocation41_spill]] %s3003_s10 }
   0xa   :  { %3037 = sst [smem:[#allocation42_spill]] %s3004_s11  ;;  %p2141_p4 = pnand %p2140_p3, %p2134_p0 }
   0xb   :  { %3038 = sst [smem:[#allocation43_spill]] %s3005_s13 }
   0xc   :  { %2144 = shalt.err (!%p2141_p4)  }
   0xd   :  { %s2227_s17 = smov [#allocation7]   ;;  %s2145_s0 = scalar_lea.vmem %s23_s30, 16 }
   0xe   :  { %21 = dma.vmem_to_smem %s19_s27, 16, %s2227_s17, [#allocation6] }
   0xf   :  { %p2146_p5 = scmp.ne.s32.totalorder %s23_s30, %s2145_s0  ;;  %p2150_p6 = scmp.lt.s32.totalorder %s23_s30, %s23_s30 }
  0x10   :  { %p2151_p7 = scmp.lt.s32.totalorder %s2145_s0, %s2145_s0 }
  0x12   :  { %p2152_p8 = por %p2151_p7, %p2150_p6 }
  0x14   :  { %p2153_p9 = pnand %p2152_p8, %p2146_p5 }
  0x16   :  { %2156 = shalt.err (!%p2153_p9)  }
  0x17   :  { %s2228_s1 = smov [#allocation8]  }
  0x18   :  { %25 = dma.vmem_to_smem %s23_s30, 16, %s2228_s1, [#allocation6] }
  0x19   :  { %2201 = dma.done.wait [#allocation6], 32 }
  0x1a   :  { %2202 = vsyncadd [#allocation6], 4294967264 }
  0x1b   :  { %29 = sfence }
  0x1c   :  { %30 = vsyncpa [#allocation11], 0  ;;  %s2315_s12 = smov 0   ;;  %s2317_s18 = smov 0  }
  0x1d   :  { %s2319_s19 = smov 0   ;;  %s2321_s20 = smov 0  }
  0x1e   :  { %s2323_s21 = smov 0  }
  0x1f LB: > { %3039 = sst [smem:[#allocation14_spill]] %s2209_s12  ;;  %s45_s23 = sadd.s32 1, %s2217_s19  ;;  %s2225_s21 = sphi %s2323_s21, %s36_s21   ;;  %s2221_s20 = sphi %s2321_s20, %s3112_s20   ;;  %s2217_s19 = sphi %s2319_s19, %s3111_s19   ;;  %s2213_s18 = sphi %s2317_s18, %s3110_s18   ;;  %s2209_s12 = sphi %s2315_s12, %s3109_s12  }
  0x20   : > { %3040 = sst [smem:[#allocation15_spill]] %s2213_s18  ;;  %p46_p10 = scmp.ge.s32.totalorder %s45_s23, 2 }
  0x21   : > { %3041 = sst [smem:[#allocation16_spill]] %s2217_s19  ;;  %s48_s24 = sadd.s32 1, %s2221_s20 }
  0x22   : > { %3042 = sst [smem:[#allocation17_spill]] %s2221_s20  ;;  %p1846_p11 = scmp.ge.s32.totalorder %s2225_s21, 1 }
  0x23   : > { %3043 = sst [smem:[#allocation18_spill]] %s2225_s21  ;;  %p388_p12 = scmp.lt.s32.totalorder %s2225_s21, 7 }
  0x24   : > { %s3114_s23 = smov (%p46_p10, %s45_s23), 0  ;;  %s3116_s24 = smov (!%p46_p10, %s48_s24), %s2221_s20 }
  0x25   : > { %3044 = sst [smem:[#allocation19_spill]] %s3114_s23  ;;  %p389_p13 = pnand %p1846_p11, %p388_p12 }
  0x26   : > { %p50_p0 = scmp.ge.s32.totalorder %s3116_s24, 3 }
  0x27   : > { %392 = sbr.rel (%p389_p13) target bundleno = 1625 (0x659), region = 64 }
  0x28   : > { %s3118_s24 = smov (%p50_p0, %s3116_s24), 0 }
  0x29   : > { %3045 = sst [smem:[#allocation20_spill]] %s3118_s24 }
  0x2c   : > { %s1847_s25 = sshll.u32 %s2209_s12, 1  ;;  %p442_p1 = scmp.lt.s32.totalorder %s2213_s18, 2 }
  0x2d   : > { %p437_p2 = scmp.lt.s32.totalorder %s1847_s25, 3  ;;  %p455_p3 = scmp.eq.s32.totalorder %s2213_s18, 0 }
  0x2e   : > { %s2354_s26 = scalar_select %p442_p1, %s2213_s18, 2 }
  0x2f   : > { %s3120_s25 = smov (!%p437_p2, %s1847_s25), 3  ;;  %s3047_s4 = sld [smem:[#allocation35_spill]] }
  0x30   : > { %s1883_s27 = sshll.u32 %s2354_s26, 4  ;;  %s1848_s14 = sshll.u32 %s3120_s25, 3 }
  0x31   : > { %s3048_s3 = sld [smem:[#allocation34_spill]]  ;;  %p456_p4 = scmp.eq.s32.totalorder %s2209_s12, 0 }
  0x32   : > { %s3049_s5 = sld [smem:[#allocation36_spill]] }
  0x33   : > { %p457_p5 = pnand %p456_p4, %p455_p3 }
  0x34   : > { %s3050_s2 = sld [smem:[#allocation33_spill]] (!%p457_p5) }
  0x35   : > { %s446_s17 = scalar_lea.vmem %s3047_s4, %s1883_s27  ;;  %460 = sbr.rel (%p457_p5) target bundleno = 60 (0x3c), region = 68 }
  0x37   : > { %s2367_s22 = scalar_lea.vmem %s3048_s3, %s1848_s14 }
  0x38   : > { %s2372_s20 = scalar_lea.vmem %s3049_s5, %s1883_s27 }
  0x3a   : > { %v461_v1 = vld [vmem:[%s3050_s2] sm:$0xff]  ;;  %vm462_vm0 = vcmask 130048  }
  0x3b   : > { %463 = vst.msk [vmem:[#allocation2] sm:$0xff] %vm462_vm0, %v461_v1 }
  0x3c PF: > { %p1853_p6 = scmp.ne.s32.totalorder %s2209_s12, 0 }
  0x3d   : > { %s2231_s23 = smov (!%p1853_p6), 96  }
  0x3e   : > { %466 = sbr.rel (%p1853_p6) target bundleno = 381 (0x17d), region = 72 }
  0x43   : > { %v469_v2 = vld [vmem:[%s446_s17 + $0x8] sm:$0xff]  ;;  %v2229_v3 = vmov 0.0   ;;  %v468_v4 = vld [vmem:[%s446_s17] sm:$0xff]  ;;  %vm2230_vm1 = vmmov 0   ;;  %vm470_vm2 = vcmask 130048   ;;  %vm544_vm3 = vcmask 261120  }
  0x44   : > { %1903 = vmatprep.subr.mxu0 %v2229_v3  ;;  %1907 = vmatprep.mubr.msk.f32.mxu0 %vm2230_vm1, %v2229_v3  ;;  %v467_v5 = vld [vmem:[#allocation2] sm:$0xff] }
  0x45   : > { %1904 = vmatpush3.msra.mxu0 %v469_v2 }
  0x46   : > { %1905 = vmatprep.subr.mxu0 %v2229_v3 }
  0x47   : > { %1906 = vmatpush3.msra.mxu0 %v468_v4 }
  0x48   : > { %1908 = vmatmul.mubr.msk.f32.vlgmr.msra.gmra.mxu0 %vm470_vm2, %v467_v5 }
 0x108   : > { %v540_v6 = vpop.f32.mrf.mxu0 }
 0x109   : > { %547 = vrot.lane.b32.xlu0 %v540_v6, %s2231_s23  ;;  %545 = vst.msk [vmem:[#allocation3] sm:$0xff] %vm544_vm3, %v540_v6 }
 0x10a   : > { %v1909_v7 = vpop.f32.mrf.mxu0 }
 0x17b   : > { %v548_v8 = vpop.permute.xlu0 %547 }
 0x17c   : > { %550 = vst.msk [vmem:[#allocation4] sm:$0xff] %vm544_vm3, %v548_v8 }
 0x17d PF: > { %v554_v9 = vld [vmem:[%s2372_s20 + $0x8] sm:$0x3]  ;;  %vm569_vm4 = vcmask 1041408   ;;  %v553_v10 = vld [vmem:[%s2372_s20] sm:$0xff]  ;;  %vm562_vm5 = vcmask 80896   ;;  %s2384_s24 = sshll.u32 %s2209_s12, 4 }
 0x17e   : > { %v551_v11 = vld [vmem:[%s2367_s22] sm:$0xff]  ;;  %1910 = vmatprep.subr.msk.mxu0 %vm569_vm4, %v554_v9  ;;  %v552_v12 = vld [vmem:[%s2367_s22 + $0x8] sm:$0xff]  ;;  %s2387_s20 = sadd.s32 2, %s2384_s24  ;;  %s2396_s27 = sld [smem:[#allocation7 + %s2384_s24]]  ;;  %vm648_vm6 = vcmask 261120  }
 0x17f   : > { %1914 = vmatprep.mubr.msk.f32.mxu0 %vm562_vm5, %v551_v11  ;;  %1911 = vmatpush3.msk.msra.mxu0 %vm569_vm4, %v554_v9  ;;  %3051 = sst [smem:[#allocation21_spill]] %s2387_s20  ;;  %s2399_s14 = sadd.s32 3, %s2384_s24 }
 0x180   : > { %1912 = vmatprep.subr.mxu0 %v553_v10  ;;  %s2390_s25 = sld [smem:[#allocation7 + %s2387_s20]]  ;;  %s2408_s17 = sadd.s32 1, %s2384_s24 }
 0x181   : > { %1913 = vmatpush3.msra.mxu0 %v553_v10  ;;  %s2393_s22 = sld [smem:[#allocation8 + %s2387_s20]]  ;;  %s2417_s28 = sadd.s32 5, %s2384_s24 }
 0x182   : > { %1915 = vmatmul.mubr.msk.f32.vlgmr.msra.gmra.mxu0 %vm562_vm5, %v552_v12  ;;  %3052 = sst [smem:[#allocation22_spill]] %s2399_s14  ;;  %s2426_s30 = sadd.s32 4, %s2384_s24 }
 0x183   : > { %s2402_s15 = sld [smem:[#allocation8 + %s2384_s24]]  ;;  %s2432_s3 = sadd.s32 7, %s2384_s24 }
 0x184   : > { %s2405_s16 = sld [smem:[#allocation7 + %s2399_s14]]  ;;  %s2441_s19 = sadd.s32 6, %s2384_s24 }
 0x185   : > { %3053 = sst [smem:[#allocation23_spill]] %s2408_s17  ;;  %s2450_s10 = sadd.s32 9, %s2384_s24 }
 0x186   : > { %s2411_s0 = sld [smem:[#allocation8 + %s2399_s14]]  ;;  %s2459_s9 = sadd.s32 8, %s2384_s24 }
 0x187   : > { %s2414_s1 = sld [smem:[#allocation7 + %s2408_s17]]  ;;  %s2468_s12 = sadd.s32 11, %s2384_s24 }
 0x188   : > { %3054 = sst [smem:[#allocation24_spill]] %s2417_s28  ;;  %s2482_s20 = sadd.s32 10, %s2384_s24 }
 0x189   : > { %s2420_s29 = sld [smem:[#allocation8 + %s2408_s17]]  ;;  %p661_p7 = scmp.lt.s32.totalorder %s2384_s24, 20 }
 0x18a   : > { %s2423_s23 = sld [smem:[#allocation7 + %s2417_s28]] }
 0x18b   : > { %3055 = sst [smem:[#allocation25_spill]] %s2426_s30 }
 0x18c   : > { %s2429_s2 = sld [smem:[#allocation8 + %s2417_s28]] }
 0x18d   : > { %3056 = sst [smem:[#allocation26_spill]] %s2432_s3 }
 0x18e   : > { %s2435_s4 = sld [smem:[#allocation7 + %s2426_s30]] }
 0x18f   : > { %s2438_s5 = sld [smem:[#allocation8 + %s2426_s30]]  ;;  %s753_s30 = scalar_lea.vmem [#allocation4], %s2393_s22 }
 0x190   : > { %3057 = sst [smem:[#allocation27_spill]] %s2441_s19  ;;  %v754_v19 = vld [vmem:[%s753_s30] sm:$0x1]  ;;  %s705_s30 = scalar_lea.vmem [#allocation4], %s2420_s29 }
 0x191   : > { %s2444_s13 = sld [smem:[#allocation7 + %s2432_s3]]  ;;  %v706_v25 = vld [vmem:[%s705_s30] sm:$0x1] }
 0x192   : > { %s2447_s21 = sld [smem:[#allocation8 + %s2432_s3]] }
 0x193   : > { %3058 = sst [smem:[#allocation28_spill]] %s2450_s10 }
 0x194   : > { %s2453_s11 = sld [smem:[#allocation7 + %s2441_s19]] }
 0x195   : > { %s2456_s8 = sld [smem:[#allocation8 + %s2441_s19]] }
 0x196   : > { %3059 = sst [smem:[#allocation29_spill]] %s2459_s9 }
 0x197   : > { %s2462_s7 = sld [smem:[#allocation7 + %s2450_s10]] }
 0x198   : > { %s2465_s28 = sld [smem:[#allocation8 + %s2450_s10]] }
 0x199   : > { %3060 = sst [smem:[#allocation30_spill]] %s2468_s12 }
 0x19a   : > { %s2471_s3 = sld [smem:[#allocation7 + %s2459_s9]] }
 0x19b   : > { %s3061_s6 = sld [smem:[#allocation37_spill]] }
 0x19c   : > { %s2479_s14 = sld [smem:[#allocation8 + %s2459_s9]]  ;;  %s799_s9 = scalar_lea.vmem [#allocation3], %s2405_s16 }
 0x19d   : > { %3063 = sst [smem:[#allocation31_spill]] %s2482_s20  ;;  %v800_v22 = vld [vmem:[%s799_s9] sm:$0x1]  ;;  %s847_s16 = scalar_lea.vmem [#allocation3], %s2435_s4 }
 0x19e   : > { %s2485_s10 = sld [smem:[#allocation7 + %s2468_s12]]  ;;  %v848_v31 = vld [vmem:[%s847_s16] sm:$0x1]  ;;  %s1089_s30 = scalar_lea.vmem [#allocation4], %s2465_s28 }
 0x19f   : > { %s2488_s17 = sld [smem:[#allocation8 + %s2468_s12]]  ;;  %s654_s12 = scalar_lea.vmem [#allocation3], %s2396_s27  ;;  %v1090_v36 = vld [vmem:[%s1089_s30] sm:$0x1] }
 0x1a0   : > { %s2491_s18 = sld [smem:[#allocation7 + %s2482_s20]]  ;;  %v655_v20 = vld [vmem:[%s654_s12] sm:$0x1]  ;;  %s895_s12 = scalar_lea.vmem [#allocation3], %s2423_s23 }
 0x1a1   : > { %s3062_s19 = scalar_lea.vmem %s3061_s6, %s2354_s26  ;;  %s751_s26 = scalar_lea.vmem [#allocation3], %s2390_s25  ;;  %v896_v26 = vld [vmem:[%s895_s12] sm:$0x1] }
 0x1a2   : > { %v1855_v13 = vld [vmem:[%s3062_s19] ss:$0 sm:$0xff]  ;;  %s2494_s19 = sld [smem:[#allocation8 + %s2482_s20]]  ;;  %s2500_s6 = sadd.s32 13, %s2384_s24 }
 0x1a3   : > { %v752_v18 = vld [vmem:[%s751_s26] sm:$0x1]  ;;  %s656_s20 = scalar_lea.vmem [#allocation4], %s2402_s15  ;;  %s2508_s25 = sadd.s32 12, %s2384_s24 }
 0x1a4   : > { %v657_v21 = vld [vmem:[%s656_s20] sm:$0x1]  ;;  %s703_s26 = scalar_lea.vmem [#allocation3], %s2414_s1  ;;  %s2513_s27 = sld [smem:[#allocation7 + %s2500_s6]]  ;;  %v755_v28 = vadd.f32 %v754_v19, %v752_v18 }
 0x1a5   : > { %v704_v24 = vld [vmem:[%s703_s26] sm:$0x1]  ;;  %s897_s20 = scalar_lea.vmem [#allocation4], %s2429_s2  ;;  %s2518_s9 = sld [smem:[#allocation8 + %s2500_s6]]  ;;  %v658_v29 = vadd.f32 %v657_v21, %v655_v20 }
 0x1a6   : > { %v898_v27 = vld [vmem:[%s897_s20] sm:$0x1]  ;;  %s849_s1 = scalar_lea.vmem [#allocation4], %s2438_s5  ;;  %v707_v33 = vadd.f32 %v706_v25, %v704_v24  ;;  %s2526_s23 = sld [smem:[#allocation8 + %s2508_s25]] }
 0x1a7   : > { %v850_v32 = vld [vmem:[%s849_s1] sm:$0x1]  ;;  %v899_v34 = vadd.f32 %v898_v27, %v896_v26  ;;  %s1087_s26 = scalar_lea.vmem [#allocation3], %s2462_s7  ;;  %s2531_s12 = sadd.s32 15, %s2384_s24 }
 0x1a8   : > { %3064 = sst [smem:[#allocation32_spill]] %s2494_s19  ;;  %s801_s19 = scalar_lea.vmem [#allocation4], %s2411_s0  ;;  %v1088_v35 = vld [vmem:[%s1087_s26] sm:$0x1]  ;;  %v851_v40 = vadd.f32 %v850_v32, %v848_v31 }
 0x1a9   : > { %v802_v23 = vld [vmem:[%s801_s19] sm:$0x1]  ;;  %s2523_s19 = sld [smem:[#allocation7 + %s2508_s25]]  ;;  %s2534_s4 = sadd.s32 14, %s2384_s24  ;;  %v1091_v62 = vadd.f32 %v1090_v36, %v1088_v35 }
 0x1aa   : > { %v803_v30 = vadd.f32 %v802_v23, %v800_v22  ;;  %s991_s20 = scalar_lea.vmem [#allocation3], %s2444_s13  ;;  %s993_s16 = scalar_lea.vmem [#allocation4], %s2447_s21 }
 0x1ab   : > { %v992_v41 = vld [vmem:[%s991_s20] sm:$0x1]  ;;  %s943_s7 = scalar_lea.vmem [#allocation3], %s2453_s11  ;;  %s945_s1 = scalar_lea.vmem [#allocation4], %s2456_s8 }
 0x1ac   : > { %v994_v42 = vld [vmem:[%s993_s16] sm:$0x1]  ;;  %s3065_s13 = sld [smem:[#allocation32_spill]]  ;;  %s1039_s26 = scalar_lea.vmem [#allocation3], %s2471_s3 }
 0x1ad   : > { %v944_v43 = vld [vmem:[%s943_s7] sm:$0x1]  ;;  %s1041_s11 = scalar_lea.vmem [#allocation4], %s2479_s14  ;;  %s1183_s30 = scalar_lea.vmem [#allocation3], %s2485_s10  ;;  %v995_v2 = vadd.f32 %v994_v42, %v992_v41 }
 0x1ae   : > { %v946_v44 = vld [vmem:[%s945_s1] sm:$0x1]  ;;  %s1185_s20 = scalar_lea.vmem [#allocation4], %s2488_s17  ;;  %s1135_s16 = scalar_lea.vmem [#allocation3], %s2491_s18 }
 0x1af   : > { %v1040_v51 = vld [vmem:[%s1039_s26] sm:$0x1]  ;;  %s2554_s7 = sld [smem:[#allocation7 + %s2531_s12]]  ;;  %v947_v4 = vadd.f32 %v946_v44, %v944_v43  ;;  %s1279_s26 = scalar_lea.vmem [#allocation3], %s2513_s27 }
 0x1b0   : > { %v1042_v52 = vld [vmem:[%s1041_s11] sm:$0x1]  ;;  %s2561_s1 = sld [smem:[#allocation8 + %s2531_s12]]  ;;  %s1281_s11 = scalar_lea.vmem [#allocation4], %s2518_s9 }
 0x1b1   : > { %v1184_v53 = vld [vmem:[%s1183_s30] sm:$0x1]  ;;  %s2567_s10 = sld [smem:[#allocation7 + %s2534_s4]]  ;;  %v1043_v8 = vadd.f32 %v1042_v52, %v1040_v51  ;;  %s1231_s27 = scalar_lea.vmem [#allocation3], %s2523_s19 }
 0x1b2   : > { %v1186_v55 = vld [vmem:[%s1185_s20] sm:$0x1]  ;;  %s1137_s3 = scalar_lea.vmem [#allocation4], %s3065_s13  ;;  %s2571_s18 = sld [smem:[#allocation8 + %s2534_s4]] }
 0x1b3   : > { %v1136_v56 = vld [vmem:[%s1135_s16] sm:$0x1]  ;;  %v1187_v10 = vadd.f32 %v1186_v55, %v1184_v53  ;;  %s1233_s30 = scalar_lea.vmem [#allocation4], %s2526_s23 }
 0x1b4   : > { %v1138_v59 = vld [vmem:[%s1137_s3] sm:$0x1] }
 0x1b5   : > { %v1280_v23 = vld [vmem:[%s1279_s26] sm:$0x1]  ;;  %s1375_s20 = scalar_lea.vmem [#allocation3], %s2554_s7  ;;  %s2232_s7 = smov 112  }
 0x1b6   : > { %v1282_v27 = vld [vmem:[%s1281_s11] sm:$0x1]  ;;  %s1377_s16 = scalar_lea.vmem [#allocation4], %s2561_s1 }
 0x1b7   : > { %v1378_v51 = vld [vmem:[%s1377_s16] sm:$0x1]  ;;  %s1327_s3 = scalar_lea.vmem [#allocation3], %s2567_s10  ;;  %s3085_s10 = sld [smem:[#allocation23_spill]] }
 0x1b8   : > { %v1328_v52 = vld [vmem:[%s1327_s3] sm:$0x1]  ;;  %s1329_s19 = scalar_lea.vmem [#allocation4], %s2571_s18  ;;  %s3087_s16 = sld [smem:[#allocation22_spill]] }
 0x1b9   : > { %v1330_v53 = vld [vmem:[%s1329_s19] sm:$0x1]  ;;  %s662_s26 = scalar_select %p661_p7, 1, 0 }
 0x1ba   : > { %s744_s3 = scalar_lea.vmem [#allocation2], %s2420_s29  ;;  %s3090_s29 = sld [smem:[#allocation14_spill]] }
 0x1bb   : > { %s663_s11 = scvt.s32.f32 %s662_s26 }
 0x1bd   : > { %p710_p8 = scmp.lt.s32.totalorder %s3085_s10, 20  ;;  %s3089_s10 = sld [smem:[#allocation15_spill]] }
 0x1be   : > { %p806_p10 = scmp.lt.s32.totalorder %s3087_s16, 20 }
 0x1bf   : > { %s711_s24 = scalar_select %p710_p8, 1, 0 }
 0x1c0   : > { %s807_s26 = scalar_select %p806_p10, 1, 0 }
 0x1c1   : > { %p1421_p13 = scmp.eq.s32.totalorder %s3090_s29, 1  ;;  %p1238_p8 = scmp.lt.s32.totalorder %s2508_s25, 20 }
 0x1c2   : > { %p1334_p10 = scmp.lt.s32.totalorder %s2534_s4, 20 }
 0x1c3   : > { %p1420_p12 = scmp.eq.s32.totalorder %s3089_s10, 2 }
 0x1c5   : > { %p2874_p0 = pnand %p1421_p13, %p1420_p12 }
 0x242   : > { %v1916_v14 = vpop.f32.mrf.mxu0 }
 0x243   : > { %v645_v15 = vadd.f32 %v1916_v14, %v1855_v13  ;;  %v1139_v14 = vadd.f32 %v1138_v59, %v1136_v56 }
 0x244   : > { %v639_v16 = vpop.f32.mrf.mxu0 }
 0x245   : > { %650 = vst.msk [vmem:[#allocation5 + $0x8] sm:$0xff] %vm648_vm6, %v645_v15  ;;  %v640_v17 = vadd.f32 %v1855_v13, %v639_v16 }
 0x247   : > { %649 = vst.msk [vmem:[#allocation5] sm:$0xff] %vm648_vm6, %v640_v17 }
 0x24c   : > { %v1092_v63 = vld [vmem:[#allocation5 + $0x9] sm:$0x1]  ;;  %v1044_v9 = vld [vmem:[#allocation5 + $0x8] sm:$0x1]  ;;  %v1188_v22 = vld [vmem:[#allocation5 + $0xb] sm:$0x1] }
 0x24d   : > { %v2576_v18 = vadd.f32 %v1092_v63, %v1091_v62  ;;  %v1284_v44 = vld [vmem:[#allocation5 + $0xd] sm:$0x1] }
 0x24e   : > { %v756_v37 = vld [vmem:[#allocation5 + $0x2] sm:$0x1]  ;;  %v659_v38 = vld [vmem:[#allocation5] sm:$0x1]  ;;  %v804_v39 = vld [vmem:[#allocation5 + $0x3] sm:$0x1] }
 0x24f   : > { %v2540_v45 = vadd.f32 %v756_v37, %v755_v28  ;;  %v2542_v46 = vadd.f32 %v659_v38, %v658_v29  ;;  %v2544_v47 = vadd.f32 %v804_v39, %v803_v30  ;;  %v708_v48 = vld [vmem:[#allocation5 + $0x1] sm:$0x1]  ;;  %v900_v49 = vld [vmem:[#allocation5 + $0x5] sm:$0x1]  ;;  %v852_v50 = vld [vmem:[#allocation5 + $0x4] sm:$0x1]  ;;  %v2584_v29 = vadd.f32 %v1044_v9, %v1043_v8 }
 0x250   : > { %v2549_v54 = vadd.f32 %v708_v48, %v707_v33  ;;  %v2557_v58 = vadd.f32 %v900_v49, %v899_v34  ;;  %v2564_v61 = vadd.f32 %v852_v50, %v851_v40  ;;  %v996_v3 = vld [vmem:[#allocation5 + $0x7] sm:$0x1]  ;;  %v948_v7 = vld [vmem:[#allocation5 + $0x6] sm:$0x1]  ;;  %v1140_v30 = vld [vmem:[#allocation5 + $0xa] sm:$0x1]  ;;  %v2587_v33 = vadd.f32 %v1188_v22, %v1187_v10 }
 0x251   : > { %v770_v57 = vand.u32 2147483647, %v2540_v45  ;;  %v673_v60 = vand.u32 2147483647, %v2542_v46  ;;  %v818_v1 = vand.u32 2147483647, %v2544_v47  ;;  %v2578_v21 = vadd.f32 %v996_v3, %v995_v2 }
 0x252   : > { %v722_v6 = vand.u32 2147483647, %v2549_v54  ;;  %v914_v13 = vand.u32 2147483647, %v2557_v58  ;;  %v866_v17 = vand.u32 2147483647, %v2564_v61  ;;  %v2581_v26 = vadd.f32 %v948_v7, %v947_v4 }
 0x253   : > { %v771_v0 = vsub.f32 0.0, %v770_v57  ;;  %v674_v5 = vsub.f32 0.0, %v673_v60  ;;  %v819_v12 = vsub.f32 0.0, %v818_v1  ;;  %v1010_v32 = vand.u32 2147483647, %v2578_v21 }
 0x254   : > { %v723_v16 = vsub.f32 0.0, %v722_v6  ;;  %v915_v20 = vsub.f32 0.0, %v914_v13  ;;  %v867_v25 = vsub.f32 0.0, %v866_v17  ;;  %v962_v34 = vand.u32 2147483647, %v2581_v26 }
 0x255   : > { %v772_v11 = vmul.f32 1.442695, %v771_v0  ;;  %v675_v15 = vmul.f32 1.442695, %v674_v5  ;;  %v820_v19 = vmul.f32 1.442695, %v819_v12  ;;  %v2591_v37 = vadd.f32 %v1140_v30, %v1139_v14 }
 0x256   : > { %v724_v24 = vmul.f32 1.442695, %v723_v16  ;;  %v916_v28 = vmul.f32 1.442695, %v915_v20  ;;  %v868_v31 = vmul.f32 1.442695, %v867_v25  ;;  %v1283_v38 = vadd.f32 %v1282_v27, %v1280_v23 }
 0x257   : > { %1997 = vpow2.f32 %v772_v11  ;;  %v1106_v35 = vand.u32 2147483647, %v2576_v18  ;;  %v1011_v36 = vsub.f32 0.0, %v1010_v32  ;;  %v1232_v39 = vld [vmem:[%s1231_s27] sm:$0x1]  ;;  %v963_v41 = vsub.f32 0.0, %v962_v34 }
 0x258   : > { %1999 = vpow2.f32 %v675_v15  ;;  %v1234_v40 = vld [vmem:[%s1233_s30] sm:$0x1]  ;;  %v1058_v43 = vand.u32 2147483647, %v2584_v29  ;;  %v1202_v49 = vand.u32 2147483647, %v2587_v33  ;;  %v2602_v63 = vadd.f32 %v1284_v44, %v1283_v38 }
 0x259   : > { %2001 = vpow2.f32 %v820_v19  ;;  %v1107_v42 = vsub.f32 0.0, %v1106_v35  ;;  %v1012_v48 = vmul.f32 1.442695, %v1011_v36  ;;  %v1376_v50 = vld [vmem:[%s1375_s20] sm:$0x1]  ;;  %v1235_v59 = vadd.f32 %v1234_v40, %v1232_v39  ;;  %s3086_s27 = sld [smem:[#allocation21_spill]]  ;;  %s712_s20 = scvt.s32.f32 %s711_s24 }
 0x25a   : > { %2003 = vpow2.f32 %v724_v24  ;;  %v964_v55 = vmul.f32 1.442695, %v963_v41  ;;  %v1059_v57 = vsub.f32 0.0, %v1058_v43  ;;  %v1203_v60 = vsub.f32 0.0, %v1202_v49  ;;  %v1236_v0 = vld [vmem:[#allocation5 + $0xc] sm:$0x1] }
 0x25b   : > { %2005 = vpow2.f32 %v916_v28  ;;  %v1108_v56 = vmul.f32 1.442695, %v1107_v42  ;;  %v1154_v62 = vand.u32 2147483647, %v2591_v37  ;;  %v1103_v4 = vmax.f32 %v2576_v18, 0.0  ;;  %s695_s30 = scalar_lea.vmem [#allocation2], %s2402_s15 }
 0x25c   : > { %2007 = vpow2.f32 %v868_v31  ;;  %v1060_v1 = vmul.f32 1.442695, %v1059_v57  ;;  %v1204_v2 = vmul.f32 1.442695, %v1203_v60  ;;  %v2605_v5 = vadd.f32 %v1236_v0, %v1235_v59  ;;  %v1380_v28 = vld [vmem:[#allocation5 + $0xf] sm:$0x1] }
 0x25d   : > { %2009 = vpow2.f32 %v1012_v48  ;;  %v1155_v3 = vsub.f32 0.0, %v1154_v62  ;;  %v1379_v6 = vadd.f32 %v1378_v51, %v1376_v50  ;;  %v1331_v7 = vadd.f32 %v1330_v53, %v1328_v52  ;;  %v1332_v49 = vld [vmem:[#allocation5 + $0xe] sm:$0x1] }
 0x25e   : > { %2011 = vpow2.f32 %v964_v55  ;;  %v767_v9 = vmax.f32 %v2540_v45, 0.0  ;;  %v670_v10 = vmax.f32 %v2542_v46, 0.0  ;;  %v1298_v11 = vand.u32 2147483647, %v2602_v63 }
 0x25f   : > { %2013 = vpow2.f32 %v1108_v56  ;;  %v815_v14 = vmax.f32 %v2544_v47, 0.0  ;;  %v719_v15 = vmax.f32 %v2549_v54, 0.0  ;;  %v911_v16 = vmax.f32 %v2557_v58, 0.0  ;;  %p758_p9 = scmp.lt.s32.totalorder %s3086_s27, 20  ;;  %s808_s27 = scvt.s32.f32 %s807_s26 }
 0x260   : > { %2015 = vpow2.f32 %v1060_v1  ;;  %v863_v20 = vmax.f32 %v2564_v61, 0.0  ;;  %v1156_v22 = vmul.f32 1.442695, %v1155_v3  ;;  %v1007_v25 = vmax.f32 %v2578_v21, 0.0  ;;  %s3095_s26 = sld [smem:[#allocation29_spill]] }
 0x261   : > { %2017 = vpow2.f32 %v1204_v2  ;;  %v959_v27 = vmax.f32 %v2581_v26, 0.0  ;;  %v1299_v34 = vsub.f32 0.0, %v1298_v11  ;;  %v1055_v36 = vmax.f32 %v2584_v29, 0.0  ;;  %s759_s15 = scalar_select %p758_p9, 1, 0 }
 0x262   : > { %v1250_v41 = vand.u32 2147483647, %v2605_v5  ;;  %v2629_v42 = vadd.f32 %v1380_v28, %v1379_v6  ;;  %v2646_v2 = vadd.f32 %v1332_v49, %v1331_v7  ;;  %vm768_vm9 = vcmp.ne.f32.partialorder %v2540_v45, %v2540_v45  ;;  %p1286_p9 = scmp.lt.s32.totalorder %s2500_s6, 20 }
 0x263   : > { %v2634_v53 = vmul.f32 1.442695, %v1299_v34  ;;  %vm671_vm10 = vcmp.ne.f32.partialorder %v2542_v46, %v2542_v46  ;;  %vm816_vm13 = vcmp.ne.f32.partialorder %v2544_v47, %v2544_v47  ;;  %vm720_vm15 = vcmp.ne.f32.partialorder %v2549_v54, %v2549_v54  ;;  %s760_s19 = scvt.s32.f32 %s759_s15  ;;  %s3093_s15 = sld [smem:[#allocation27_spill]] }
 0x264   : > { %v1998_v8 = vpop.eup %1997  ;;  %vm912_vm2 = vcmp.ne.f32.partialorder %v2557_v58, %v2557_v58  ;;  %vm864_vm3 = vcmp.ne.f32.partialorder %v2564_v61, %v2564_v61  ;;  %s1287_s25 = scalar_select %p1286_p9, 1, 0 }
 0x265   : > { %v2000_v12 = vpop.eup %1999  ;;  %v774_v13 = vadd.f32 1.0, %v1998_v8  ;;  %v777_v31 = vmul.f32 -0.5, %v1998_v8  ;;  %v780_v40 = vand.u32 2147483647, %v1998_v8  ;;  %s1335_s6 = scalar_select %p1334_p10, 1, 0 }
 0x266   : > { %v2613_v17 = vpop.eup %2001  ;;  %v677_v19 = vadd.f32 1.0, %v2000_v12  ;;  %v680_v32 = vmul.f32 -0.5, %v2000_v12  ;;  %v683_v43 = vand.u32 2147483647, %v2000_v12  ;;  %p1046_p4 = scmp.lt.s32.totalorder %s3095_s26, 20 }
 0x267   : > { %v2616_v23 = vpop.eup %2003  ;;  %2019 = vlog2.f32 %v774_v13  ;;  %v822_v24 = vadd.f32 1.0, %v2613_v17  ;;  %v825_v44 = vmul.f32 -0.5, %v2613_v17  ;;  %v778_v50 = vadd.f32 1.0, %v777_v31 }
 0x268   : > { %v2621_v30 = vpop.eup %2005  ;;  %2021 = vlog2.f32 %v677_v19  ;;  %v726_v35 = vadd.f32 1.0, %v2616_v23  ;;  %v681_v51 = vadd.f32 1.0, %v680_v32  ;;  %v729_v52 = vmul.f32 -0.5, %v2616_v23 }
 0x269   : > { %2023 = vlog2.f32 %v822_v24  ;;  %v2626_v39 = vpop.eup %2007  ;;  %v918_v48 = vadd.f32 1.0, %v2621_v30  ;;  %v921_v56 = vmul.f32 -0.5, %v2621_v30  ;;  %vm2641_vm7 = vcmp.lt.f32.partialorder %v780_v40, 0.0004427343  ;;  %p950_p2 = scmp.lt.s32.totalorder %s3093_s15, 20 }
 0x26a   : > { %2025 = vpow2.f32 %v1156_v22  ;;  %v2010_v55 = vpop.eup %2009  ;;  %v870_v57 = vadd.f32 1.0, %v2626_v39  ;;  %v873_v59 = vmul.f32 -0.5, %v2626_v39  ;;  %v828_v0 = vand.u32 2147483647, %v2613_v17 }
 0x26b   : > { %2027 = vlog2.f32 %v726_v35  ;;  %v2639_v60 = vpop.eup %2011  ;;  %v1014_v1 = vadd.f32 1.0, %v2010_v55  ;;  %vm2650_vm8 = vcmp.lt.f32.partialorder %v683_v43, 0.0004427343  ;;  %v826_v11 = vadd.f32 1.0, %v825_v44  ;;  %s951_s10 = scalar_select %p950_p2, 1, 0 }
 0x26c   : > { %2029 = vlog2.f32 %v918_v48  ;;  %v2648_v3 = vpop.eup %2013  ;;  %v732_v13 = vand.u32 2147483647, %v2616_v23  ;;  %v1017_v19 = vmul.f32 -0.5, %v2010_v55  ;;  %v779_v22 = vmul.f32 %v1998_v8, %v778_v50 }
 0x26d   : > { %2031 = vlog2.f32 %v870_v57  ;;  %v730_v24 = vadd.f32 1.0, %v729_v52  ;;  %v966_v28 = vadd.f32 1.0, %v2639_v60  ;;  %v2656_v31 = vpop.eup %2015  ;;  %v682_v7 = vmul.f32 %v2000_v12, %v681_v51  ;;  %s952_s29 = scvt.s32.f32 %s951_s10 }
 0x26e   : > { %2033 = vlog2.f32 %v1014_v1  ;;  %v922_v32 = vadd.f32 1.0, %v921_v56  ;;  %v924_v34 = vand.u32 2147483647, %v2621_v30  ;;  %v874_v35 = vadd.f32 1.0, %v873_v59  ;;  %v2669_v44 = vpop.eup %2017 }
 0x26f   : > { %vm2663_vm11 = vcmp.lt.f32.partialorder %v828_v0, 0.0004427343  ;;  %v876_v8 = vand.u32 2147483647, %v2626_v39  ;;  %2035 = vlog2.f32 %v966_v28  ;;  %v1110_v43 = vadd.f32 1.0, %v2648_v3 }
 0x270   : > { %v827_v12 = vmul.f32 %v2613_v17, %v826_v11  ;;  %vm2672_vm12 = vcmp.lt.f32.partialorder %v732_v13, 0.0004427343  ;;  %v1018_v49 = vadd.f32 1.0, %v1017_v19  ;;  %v1020_v50 = vand.u32 2147483647, %v2010_v55 }
 0x271   : > { %v731_v52 = vmul.f32 %v2616_v23, %v730_v24  ;;  %v969_v56 = vmul.f32 -0.5, %v2639_v60  ;;  %2037 = vlog2.f32 %v1110_v43  ;;  %v1062_v57 = vadd.f32 1.0, %v2656_v31 }
 0x272   : > { %v923_v17 = vmul.f32 %v2621_v30, %v922_v32  ;;  %vm2682_vm14 = vcmp.lt.f32.partialorder %v924_v34, 0.0004427343  ;;  %v875_v11 = vmul.f32 %v2626_v39, %v874_v35  ;;  %vm2689_vm0 = vcmp.lt.f32.partialorder %v876_v8, 0.0004427343 }
 0x273   : > { %v972_v24 = vand.u32 2147483647, %v2639_v60  ;;  %v1113_v28 = vmul.f32 -0.5, %v2648_v3  ;;  %2039 = vlog2.f32 %v1062_v57  ;;  %v1019_v34 = vmul.f32 %v2010_v55, %v1018_v49 }
 0x274   : > { %v2020_v51 = vpop.eup %2019  ;;  %vm2699_vm1 = vcmp.lt.f32.partialorder %v1020_v50, 0.0004427343  ;;  %v1206_v8 = vadd.f32 1.0, %v2669_v44  ;;  %v1116_v38 = vand.u32 2147483647, %v2648_v3 }
 0x275   : > { %v2022_v59 = vpop.eup %2021  ;;  %v776_v0 = vmul.f32 0.6931472, %v2020_v51  ;;  %vm2723_vm4 = vcmp.lt.f32.partialorder %v972_v24, 0.0004427343 }
 0x276   : > { %v2024_v13 = vpop.eup %2023  ;;  %v679_v23 = vmul.f32 0.6931472, %v2022_v59  ;;  %v970_v59 = vadd.f32 1.0, %v969_v56  ;;  %2041 = vlog2.f32 %v1206_v8  ;;  %vm2740_vm5 = vcmp.lt.f32.partialorder %v1116_v38, 0.0004427343 }
 0x277   : > { %v2695_v30 = vpop.eup %2025  ;;  %v782_v32 = vsel %vm2641_vm7, %v779_v22, %v776_v0  ;;  %v824_v39 = vmul.f32 0.6931472, %v2024_v13  ;;  %vm1008_vm7 = vcmp.ne.f32.partialorder %v2578_v21, %v2578_v21 }
 0x278   : > { %v2028_v43 = vpop.eup %2027  ;;  %v783_v51 = vadd.f32 %v782_v32, %v767_v9  ;;  %v685_v57 = vsel %vm2650_vm8, %v682_v7, %v679_v23  ;;  %v1065_v7 = vmul.f32 -0.5, %v2656_v31  ;;  %v1158_v50 = vadd.f32 1.0, %v2695_v30 }
 0x279   : > { %v686_v62 = vadd.f32 %v685_v57, %v670_v10  ;;  %v830_v55 = vsel %vm2663_vm11, %v827_v12, %v824_v39  ;;  %v728_v22 = vmul.f32 0.6931472, %v2028_v43  ;;  %v2030_v49 = vpop.eup %2029  ;;  %v971_v13 = vmul.f32 %v2639_v60, %v970_v59 }
 0x27a   : > { %v784_v9 = vsel %vm768_vm9, %v2540_v45, %v783_v51  ;;  %v831_v6 = vadd.f32 %v830_v55, %v815_v14  ;;  %v920_v12 = vmul.f32 0.6931472, %v2030_v49  ;;  %v2032_v56 = vpop.eup %2031  ;;  %v1114_v23 = vadd.f32 1.0, %v1113_v28 }
 0x27b   : > { %786 = vrot.lane.b32.xlu1 %v784_v9, %s2232_s7  ;;  %v687_v40 = vsel %vm671_vm10, %v2542_v46, %v686_v62  ;;  %v734_v14 = vsel %vm2672_vm12, %v731_v52, %v728_v22  ;;  %v2034_v32 = vpop.eup %2033  ;;  %v872_v52 = vmul.f32 0.6931472, %v2032_v56  ;;  %v1209_v39 = vmul.f32 -0.5, %v2669_v44 }
 0x27c   : > { %689 = vrot.lane.b32.xlu0 %v687_v40, %s2232_s7  ;;  %v735_v0 = vadd.f32 %v734_v14, %v719_v15  ;;  %v926_v48 = vsel %vm2682_vm14, %v923_v17, %v920_v12  ;;  %2043 = vlog2.f32 %v1158_v50  ;;  %v832_v15 = vsel %vm816_vm13, %v2544_v47, %v831_v6  ;;  %v2036_v1 = vpop.eup %2035 }
 0x27d   : > { %v927_v38 = vadd.f32 %v926_v48, %v911_v16  ;;  %v1016_v60 = vmul.f32 0.6931472, %v2034_v32  ;;  %vm960_vm8 = vcmp.ne.f32.partialorder %v2581_v26, %v2581_v26  ;;  %v1066_v17 = vadd.f32 1.0, %v1065_v7 }
 0x27e   : > { %v736_v28 = vsel %vm720_vm15, %v2549_v54, %v735_v0  ;;  %v878_v8 = vsel %vm2689_vm0, %v875_v11, %v872_v52  ;;  %2045 = vpow2.f32 %v2634_v53  ;;  %v1251_v16 = vsub.f32 0.0, %v1250_v41  ;;  %v2038_v62 = vpop.eup %2037 }
 0x27f   : > { %834 = vrot.lane.b32.xlu1 %v832_v15, %s2232_s7  ;;  %v879_v43 = vadd.f32 %v878_v8, %v863_v20  ;;  %v1022_v51 = vsel %vm2699_vm1, %v1019_v34, %v1016_v60  ;;  %v968_v57 = vmul.f32 0.6931472, %v2036_v1  ;;  %v1068_v59 = vand.u32 2147483647, %v2656_v31 }
 0x280   : > { %738 = vrot.lane.b32.xlu0 %v736_v28, %s2232_s7  ;;  %v1115_v19 = vmul.f32 %v2648_v3, %v1114_v23  ;;  %v1210_v11 = vadd.f32 1.0, %v1209_v39  ;;  %v1161_v53 = vmul.f32 -0.5, %v2695_v30  ;;  %v1252_v55 = vmul.f32 1.442695, %v1251_v16  ;;  %v2040_v22 = vpop.eup %2039 }
 0x281   : > { %v928_v41 = vsel %vm912_vm2, %v2557_v58, %v927_v38  ;;  %v1023_v20 = vadd.f32 %v1022_v51, %v1007_v25  ;;  %v974_v34 = vsel %vm2723_vm4, %v971_v13, %v968_v57  ;;  %v1112_v35 = vmul.f32 0.6931472, %v2038_v62 }
 0x282   : > { %v880_v3 = vsel %vm864_vm3, %v2564_v61, %v879_v43  ;;  %v975_v49 = vadd.f32 %v974_v34, %v959_v27  ;;  %v1067_v9 = vmul.f32 %v2656_v31, %v1066_v17  ;;  %2047 = vpow2.f32 %v1252_v55 }
 0x283   : > { %930 = vrot.lane.b32.xlu1 %v928_v41, %s2232_s7  ;;  %v1118_v25 = vsel %vm2740_vm5, %v1115_v19, %v1112_v35  ;;  %v1064_v6 = vmul.f32 0.6931472, %v2040_v22  ;;  %v1212_v10 = vand.u32 2147483647, %v2669_v44  ;;  %v1394_v7 = vand.u32 2147483647, %v2629_v42  ;;  %v2042_v27 = vpop.eup %2041 }
 0x284   : > { %882 = vrot.lane.b32.xlu0 %v880_v3, %s2232_s7  ;;  %vm1069_vm9 = vcmp.lt.f32.partialorder %v1068_v59, 0.0004427343  ;;  %v1211_v40 = vmul.f32 %v2669_v44, %v1210_v11  ;;  %v1162_v14 = vadd.f32 1.0, %v1161_v53  ;;  %v1346_v12 = vand.u32 2147483647, %v2646_v2 }
 0x285   : > { %v1024_v31 = vsel %vm1008_vm7, %v2578_v21, %v1023_v20  ;;  %v1119_v50 = vadd.f32 %v1118_v25, %v1103_v4  ;;  %v1070_v56 = vsel %vm1069_vm9, %v1067_v9, %v1064_v6  ;;  %v1395_v0 = vsub.f32 0.0, %v1394_v7 }
 0x286   : > { %v976_v44 = vsel %vm960_vm8, %v2581_v26, %v975_v49  ;;  %v1071_v13 = vadd.f32 %v1070_v56, %v1055_v36  ;;  %v1208_v23 = vmul.f32 0.6931472, %v2042_v27  ;;  %v1347_v24 = vsub.f32 0.0, %v1346_v12 }
 0x287   : > { %1026 = vrot.lane.b32.xlu1 %v1024_v31, %s2232_s7  ;;  %vm1213_vm10 = vcmp.lt.f32.partialorder %v1212_v10, 0.0004427343  ;;  %v1164_v32 = vand.u32 2147483647, %v2695_v30  ;;  %v1396_v4 = vmul.f32 1.442695, %v1395_v0  ;;  %vm1104_vm11 = vcmp.ne.f32.partialorder %v2576_v18, %v2576_v18 }
 0x288   : > { %978 = vrot.lane.b32.xlu0 %v976_v44, %s2232_s7  ;;  %v1214_v48 = vsel %vm1213_vm10, %v1211_v40, %v1208_v23  ;;  %v1348_v52 = vmul.f32 1.442695, %v1347_v24  ;;  %v1120_v15 = vsel %vm1104_vm11, %v2576_v18, %v1119_v50  ;;  %vm1056_vm12 = vcmp.ne.f32.partialorder %v2584_v29, %v2584_v29 }
 0x289   : > { %v2044_v39 = vpop.eup %2043  ;;  %v3084_v36 = vmax.f32 %v2587_v33, 0.0  ;;  %2049 = vpow2.f32 %v1396_v4  ;;  %v1072_v60 = vsel %vm1056_vm12, %v2584_v29, %v1071_v13  ;;  %v1163_v1 = vmul.f32 %v2695_v30, %v1162_v14 }
 0x28a   : > { %v1160_v17 = vmul.f32 0.6931472, %v2044_v39  ;;  %2051 = vpow2.f32 %v1348_v52  ;;  %v1151_v8 = vmax.f32 %v2591_v37, 0.0  ;;  %vm1165_vm13 = vcmp.lt.f32.partialorder %v1164_v32, 0.0004427343 }
 0x28b   : > { %v1215_v38 = vadd.f32 %v1214_v48, %v3084_v36  ;;  %1122 = vrot.lane.b32.xlu1 %v1120_v15, %s2232_s7  ;;  %v2046_v28 = vpop.eup %2045  ;;  %vm1200_vm14 = vcmp.ne.f32.partialorder %v2587_v33, %v2587_v33  ;;  %vm1152_vm15 = vcmp.ne.f32.partialorder %v2591_v37, %v2591_v37  ;;  %v1295_v25 = vmax.f32 %v2602_v63, 0.0 }
 0x28c   : > { %1074 = vrot.lane.b32.xlu0 %v1072_v60, %s2232_s7  ;;  %v1166_v16 = vsel %vm1165_vm13, %v1163_v1, %v1160_v17  ;;  %v1302_v43 = vadd.f32 1.0, %v2046_v28  ;;  %v1305_v19 = vmul.f32 -0.5, %v2046_v28  ;;  %v1308_v35 = vand.u32 2147483647, %v2046_v28 }
 0x28d   : > { %v1216_v51 = vsel %vm1200_vm14, %v2587_v33, %v1215_v38  ;;  %v1167_v57 = vadd.f32 %v1166_v16, %v1151_v8  ;;  %vm1296_vm1 = vcmp.ne.f32.partialorder %v2602_v63, %v2602_v63  ;;  %v1247_v56 = vmax.f32 %v2605_v5, 0.0 }
 0x28e   : > { %2053 = vlog2.f32 %v1302_v43  ;;  %v1306_v41 = vadd.f32 1.0, %v1305_v19  ;;  %vm1309_vm0 = vcmp.lt.f32.partialorder %v1308_v35, 0.0004427343  ;;  %vm1248_vm3 = vcmp.ne.f32.partialorder %v2605_v5, %v2605_v5 }
 0x28f   : > { %1218 = vrot.lane.b32.xlu1 %v1216_v51, %s2232_s7  ;;  %v2048_v30 = vpop.eup %2047  ;;  %v1168_v59 = vsel %vm1152_vm15, %v2591_v37, %v1167_v57  ;;  %v1391_v36 = vmax.f32 %v2629_v42, 0.0  ;;  %v1343_v1 = vmax.f32 %v2646_v2, 0.0  ;;  %vm1392_vm7 = vcmp.ne.f32.partialorder %v2629_v42, %v2629_v42 }
 0x290   : > { %1170 = vrot.lane.b32.xlu0 %v1168_v59, %s2232_s7  ;;  %v1254_v62 = vadd.f32 1.0, %v2048_v30  ;;  %v1257_v20 = vmul.f32 -0.5, %v2048_v30  ;;  %v1307_v49 = vmul.f32 %v2046_v28, %v1306_v41  ;;  %v1260_v6 = vand.u32 2147483647, %v2048_v30 }
 0x291   : > { %vm1344_vm8 = vcmp.ne.f32.partialorder %v2646_v2, %v2646_v2  ;;  %v1860_v57 = vmul.f32 -1.442695, %v2542_v46  ;;  %v693_v41 = vstv %s663_s11  ;;  %vm698_vm9 = vcmask 122880   ;;  %s792_s11 = scalar_lea.vmem [#allocation2], %s2393_s22 }
 0x292   : > { %2055 = vlog2.f32 %v1254_v62  ;;  %v1258_v9 = vadd.f32 1.0, %v1257_v20  ;;  %vm1261_vm2 = vcmp.lt.f32.partialorder %v1260_v6, 0.0004427343  ;;  %v1862_v62 = vmul.f32 -1.442695, %v2540_v45 }
 0x293   : > { %v1864_v45 = vmul.f32 -1.442695, %v2564_v61  ;;  %v742_v6 = vstv %s712_s20  ;;  %s840_s20 = scalar_lea.vmem [#allocation2], %s2411_s0  ;;  %s888_s0 = scalar_lea.vmem [#allocation2], %s2438_s5 }
 0x294   : > { %v1259_v27 = vmul.f32 %v2048_v30, %v1258_v9  ;;  %v1861_v30 = vmul.f32 -1.442695, %v2549_v54  ;;  %s936_s5 = scalar_lea.vmem [#allocation2], %s2429_s2  ;;  %s984_s2 = scalar_lea.vmem [#allocation2], %s2456_s8 }
 0x295   : > { %s1032_s8 = scalar_lea.vmem [#allocation2], %s2447_s21  ;;  %s1080_s21 = scalar_lea.vmem [#allocation2], %s2479_s14 }
 0x296   : > { %v2050_v11 = vpop.eup %2049  ;;  %s1128_s14 = scalar_lea.vmem [#allocation2], %s2465_s28  ;;  %s1176_s28 = scalar_lea.vmem [#allocation2], %s3065_s13 }
 0x297   : > { %v2052_v53 = vpop.eup %2051  ;;  %v1398_v55 = vadd.f32 1.0, %v2050_v11  ;;  %v1401_v14 = vmul.f32 -0.5, %v2050_v11  ;;  %v1404_v23 = vand.u32 2147483647, %v2050_v11  ;;  %s1224_s13 = scalar_lea.vmem [#allocation2], %s2488_s17  ;;  %s1272_s17 = scalar_lea.vmem [#allocation2], %s2526_s23 }
 0x298   : > { %v1350_v34 = vadd.f32 1.0, %v2052_v53  ;;  %v1353_v31 = vmul.f32 -0.5, %v2052_v53  ;;  %v1356_v4 = vand.u32 2147483647, %v2052_v53  ;;  %s1336_s23 = scvt.s32.f32 %s1335_s6  ;;  %s3103_s6 = sld [smem:[#allocation41_spill]] (!%p2874_p0) }
 0x299   : > { %2057 = vlog2.f32 %v1398_v55  ;;  %v1402_v13 = vadd.f32 1.0, %v1401_v14  ;;  %vm1405_vm4 = vcmp.lt.f32.partialorder %v1404_v23, 0.0004427343 }
 0x29a   : > { %2059 = vlog2.f32 %v1350_v34  ;;  %v1354_v24 = vadd.f32 1.0, %v1353_v31  ;;  %vm1357_vm5 = vcmp.lt.f32.partialorder %v1356_v4, 0.0004427343 }
 0x29b   : > { %v2054_v22 = vpop.eup %2053  ;;  %v1403_v15 = vmul.f32 %v2050_v11, %v1402_v13  ;;  %2061 = vpow2.f32 %v1860_v57 }
 0x29c   : > { %v1304_v3 = vmul.f32 0.6931472, %v2054_v22  ;;  %v1355_v60 = vmul.f32 %v2052_v53, %v1354_v24  ;;  %2063 = vpow2.f32 %v1861_v30  ;;  %v1863_v53 = vmul.f32 -1.442695, %v2544_v47  ;;  %v696_v22 = vld [vmem:[%s695_s30] sm:$0x1] }
 0x29d   : > { %2065 = vpow2.f32 %v1862_v62 }
 0x29e   : > { %v1310_v10 = vsel %vm1309_vm0, %v1307_v49, %v1304_v3 }
 0x29f   : > { %v2056_v7 = vpop.eup %2055  ;;  %v1311_v40 = vadd.f32 %v1310_v10, %v1295_v25  ;;  %v1865_v10 = vmul.f32 -1.442695, %v2557_v58  ;;  %v1866_v58 = vmul.f32 -1.442695, %v2581_v26  ;;  %v838_v26 = vstv %s808_s27 }
 0x2a0   : > { %v1256_v12 = vmul.f32 0.6931472, %v2056_v7 }
 0x2a1   : > { %v1312_v50 = vsel %vm1296_vm1, %v2602_v63, %v1311_v40 }
 0x2a2   : > { %1314 = vrot.lane.b32.xlu1 %v1312_v50, %s2232_s7  ;;  %v1262_v0 = vsel %vm1261_vm2, %v1259_v27, %v1256_v12 }
 0x2a3   : > { %v1263_v44 = vadd.f32 %v1262_v0, %v1247_v56  ;;  %v790_v0 = vstv %s760_s19 }
 0x2a5   : > { %v1264_v32 = vsel %vm1248_vm3, %v2605_v5, %v1263_v44 }
 0x2a6   : > { %v2058_v48 = vpop.eup %2057  ;;  %1266 = vrot.lane.b32.xlu0 %v1264_v32, %s2232_s7 }
 0x2a7   : > { %v2060_v52 = vpop.eup %2059  ;;  %v1400_v39 = vmul.f32 0.6931472, %v2058_v48 }
 0x2a8   : > { %v1352_v38 = vmul.f32 0.6931472, %v2060_v52  ;;  %v2062_v59 = vpop.eup %2061 }
 0x2a9   : > { %v1406_v17 = vsel %vm1405_vm4, %v1403_v15, %v1400_v39  ;;  %v667_v19 = vadd.f32 1.0, %v2062_v59  ;;  %v2064_v11 = vpop.eup %2063  ;;  %v1867_v39 = vmul.f32 -1.442695, %v2578_v21 }
 0x2aa   : > { %v1407_v28 = vadd.f32 %v1406_v17, %v1391_v36  ;;  %v1358_v8 = vsel %vm1357_vm5, %v1355_v60, %v1352_v38  ;;  %v716_v55 = vadd.f32 1.0, %v2064_v11  ;;  %v2066_v46 = vpop.eup %2065 }
 0x2ab   : > { %v1359_v16 = vadd.f32 %v1358_v8, %v1343_v1  ;;  %2067 = vrcp.f32 %v667_v19  ;;  %v764_v34 = vadd.f32 1.0, %v2066_v46 }
 0x2ac   : > { %v1408_v43 = vsel %vm1392_vm7, %v2629_v42, %v1407_v28  ;;  %2069 = vpow2.f32 %v1863_v53 }
 0x2ad   : > { %1410 = vrot.lane.b32.xlu1 %v1408_v43, %s2232_s7  ;;  %v1360_v51 = vsel %vm1344_vm8, %v2646_v2, %v1359_v16  ;;  %2071 = vrcp.f32 %v716_v55  ;;  %v1868_v16 = vmul.f32 -1.442695, %v2584_v29  ;;  %v1869_v29 = vmul.f32 -1.442695, %v2576_v18 }
 0x2ae   : > { %1362 = vrot.lane.b32.xlu0 %v1360_v51, %s2232_s7  ;;  %2073 = vpow2.f32 %v1864_v45  ;;  %s3088_s7 = sld [smem:[#allocation25_spill]]  ;;  %v1870_v18 = vmul.f32 -1.442695, %v2591_v37  ;;  %v1871_v37 = vmul.f32 -1.442695, %v2587_v33 }
 0x2af   : > { %2075 = vrcp.f32 %v764_v34  ;;  %v1872_v33 = vmul.f32 -1.442695, %v2605_v5  ;;  %v1873_v5 = vmul.f32 -1.442695, %v2602_v63  ;;  %v1874_v63 = vmul.f32 -1.442695, %v2646_v2 }
 0x2b0   : > { %2077 = vpow2.f32 %v1865_v10  ;;  %v1875_v2 = vmul.f32 -1.442695, %v2629_v42 }
 0x2b4   : > { %p854_p11 = scmp.lt.s32.totalorder %s3088_s7, 20  ;;  %s3094_s7 = sld [smem:[#allocation26_spill]] }
 0x2b6   : > { %s855_s24 = scalar_select %p854_p11, 1, 0 }
 0x2b7   : > { %p1382_p11 = scmp.lt.s32.totalorder %s2531_s12, 20 }
 0x2b8   : > { %v2068_v54 = vpop.eup %2067  ;;  %s856_s16 = scvt.s32.f32 %s855_s24 }
 0x2b9   : > { %v2070_v9 = vpop.eup %2069  ;;  %s1047_s24 = scalar_select %p1046_p4, 1, 0 }
 0x2ba   : > { %v2072_v25 = vpop.eup %2071  ;;  %v812_v7 = vadd.f32 1.0, %v2070_v9  ;;  %v886_v8 = vstv %s856_s16  ;;  %p998_p3 = scmp.lt.s32.totalorder %s3094_s7, 20  ;;  %s3097_s16 = sld [smem:[#allocation31_spill]] }
 0x2bb   : > { %v2074_v31 = vpop.eup %2073  ;;  %s1383_s4 = scalar_select %p1382_p11, 1, 0 }
 0x2bc   : > { %2079 = vrcp.f32 %v812_v7  ;;  %v2076_v50 = vpop.eup %2075  ;;  %v860_v44 = vadd.f32 1.0, %v2074_v31 }
 0x2bd   : > { %2081 = vpow2.f32 %v1866_v58  ;;  %v2078_v4 = vpop.eup %2077 }
 0x2be   : > { %2083 = vrcp.f32 %v860_v44  ;;  %v908_v15 = vadd.f32 1.0, %v2078_v4 }
 0x2bf   : > { %2085 = vpow2.f32 %v1867_v39 }
 0x2c0   : > { %2087 = vrcp.f32 %v908_v15  ;;  %p1142_p6 = scmp.lt.s32.totalorder %s3097_s16, 20  ;;  %s3100_s16 = sld [smem:[#allocation40_spill]] (!%p2874_p0) }
 0x2c1   : > { %2089 = vpow2.f32 %v1868_v16 }
 0x2c9   : > { %v2080_v48 = vpop.eup %2079 }
 0x2ca   : > { %v2082_v1 = vpop.eup %2081 }
 0x2cb   : > { %v2084_v28 = vpop.eup %2083  ;;  %v956_v43 = vadd.f32 1.0, %v2082_v1 }
 0x2cc   : > { %v2086_v62 = vpop.eup %2085 }
 0x2cd   : > { %2091 = vrcp.f32 %v956_v43  ;;  %v2088_v19 = vpop.eup %2087  ;;  %v1004_v55 = vadd.f32 1.0, %v2086_v62 }
 0x2ce   : > { %2093 = vpow2.f32 %v1869_v29  ;;  %v2090_v45 = vpop.eup %2089 }
 0x2cf   : > { %2095 = vrcp.f32 %v1004_v55 }
 0x2d0   : > { %2097 = vpow2.f32 %v1870_v18 }
 0x2da   : > { %v2092_v34 = vpop.eup %2091 }
 0x2ed   : > { %v787_v27 = vpop.permute.xlu1 %786 }
 0x2ee   : > { %v690_v20 = vpop.permute.xlu0 %689  ;;  %v789_v56 = vmul.f32 %v2076_v50, %v787_v27 }
 0x2ef   : > { %v692_v35 = vmul.f32 %v2068_v54, %v690_v20 }
 0x2f0   : > { %v791_v13 = vmul.f32 %v790_v0, %v789_v56 }
 0x2f1   : > { %v694_v3 = vmul.f32 %v693_v41, %v692_v35  ;;  %v835_v32 = vpop.permute.xlu1 %834 }
 0x2f2   : > { %v739_v49 = vpop.permute.xlu0 %738  ;;  %v837_v52 = vmul.f32 %v2080_v48, %v835_v32 }
 0x2f3   : > { %v697_v47 = vadd.f32 %v696_v22, %v694_v3  ;;  %v741_v61 = vmul.f32 %v2072_v25, %v739_v49  ;;  %v982_v22 = vstv %s952_s29  ;;  %v1052_v3 = vadd.f32 1.0, %v2090_v45  ;;  %s1239_s29 = scalar_select %p1238_p8, 1, 0 }
 0x2f4   : > { %v839_v36 = vmul.f32 %v838_v26, %v837_v52 }
 0x2f5   : > { %699 = vst.msk [vmem:[%s695_s30] sm:$0x1] %vm698_vm9, %v697_v47  ;;  %v743_v40 = vmul.f32 %v742_v6, %v741_v61  ;;  %s3091_s30 = sld [smem:[#allocation24_spill]]  ;;  %v931_v59 = vpop.permute.xlu1 %930  ;;  %2099 = vrcp.f32 %v1052_v3  ;;  %v2094_v61 = vpop.eup %2093  ;;  %s1240_s26 = scvt.s32.f32 %s1239_s29 }
 0x2f6   : > { %v883_v17 = vpop.permute.xlu0 %882  ;;  %v933_v11 = vmul.f32 %v2088_v19, %v931_v59  ;;  %v2096_v6 = vpop.eup %2095  ;;  %2101 = vpow2.f32 %v1871_v37 }
 0x2f7   : > { %v885_v21 = vmul.f32 %v2084_v28, %v883_v17  ;;  %v2098_v50 = vpop.eup %2097  ;;  %v1270_v45 = vstv %s1240_s26 }
 0x2f8   : > { %v1148_v44 = vadd.f32 1.0, %v2098_v50 }
 0x2f9   : > { %v887_v51 = vmul.f32 %v886_v8, %v885_v21  ;;  %v1027_v25 = vpop.permute.xlu1 %1026 }
 0x2fa   : > { %v979_v20 = vpop.permute.xlu0 %978  ;;  %v1029_v10 = vmul.f32 %v2096_v6, %v1027_v25 }
 0x2fb   : > { %p902_p1 = scmp.lt.s32.totalorder %s3091_s30, 20  ;;  %v981_v35 = vmul.f32 %v2092_v34, %v979_v20  ;;  %s3096_s30 = sld [smem:[#allocation28_spill]] }
 0x2fc   : > { %v745_v14 = vld [vmem:[%s744_s3] sm:$0x1] }
 0x2fd   : > { %v746_v12 = vadd.f32 %v745_v14, %v743_v40  ;;  %v983_v47 = vmul.f32 %v982_v22, %v981_v35  ;;  %v1100_v40 = vadd.f32 1.0, %v2094_v61  ;;  %v1123_v32 = vpop.permute.xlu1 %1122 }
 0x2fe   : > { %v1075_v31 = vpop.permute.xlu0 %1074 }
 0x2ff   : > { %747 = vst.msk [vmem:[%s744_s3] sm:$0x1] %vm698_vm9, %v746_v12  ;;  %s903_s3 = scalar_select %p902_p1, 1, 0  ;;  %2103 = vrcp.f32 %v1100_v40 }
 0x300   : > { %2105 = vpow2.f32 %v1872_v33 }
 0x301   : > { %s904_s19 = scvt.s32.f32 %s903_s3  ;;  %p1094_p5 = scmp.lt.s32.totalorder %s3096_s30, 20  ;;  %2107 = vrcp.f32 %v1148_v44 }
 0x302   : > { %v2100_v56 = vpop.eup %2099  ;;  %2109 = vpow2.f32 %v1873_v5  ;;  %s1384_s30 = scvt.s32.f32 %s1383_s4 }
 0x303   : > { %v934_v53 = vstv %s904_s19  ;;  %v1077_v0 = vmul.f32 %v2100_v56, %v1075_v31  ;;  %s1095_s15 = scalar_select %p1094_p5, 1, 0  ;;  %v2102_v4 = vpop.eup %2101 }
 0x304   : > { %v935_v46 = vmul.f32 %v934_v53, %v933_v11  ;;  %v1196_v39 = vadd.f32 1.0, %v2102_v4  ;;  %s1143_s19 = scalar_select %p1142_p6, 1, 0 }
 0x305   : > { %s1096_s3 = scvt.s32.f32 %s1095_s15 }
 0x306   : > { %v793_v23 = vld [vmem:[%s792_s11] sm:$0x1]  ;;  %2111 = vrcp.f32 %v1196_v39  ;;  %s1144_s7 = scvt.s32.f32 %s1143_s19 }
 0x307   : > { %v794_v24 = vadd.f32 %v793_v23, %v791_v13  ;;  %v1126_v26 = vstv %s1096_s3  ;;  %2113 = vpow2.f32 %v1874_v63 }
 0x308   : > { %v1174_v21 = vstv %s1144_s7 }
 0x309   : > { %795 = vst.msk [vmem:[%s792_s11] sm:$0x1] %vm698_vm9, %v794_v24  ;;  %s999_s11 = scalar_select %p998_p3, 1, 0 }
 0x30b   : > { %s1000_s27 = scvt.s32.f32 %s999_s11  ;;  %s1288_s11 = scvt.s32.f32 %s1287_s25 }
 0x30c   : > { %v2104_v48 = vpop.eup %2103 }
 0x30d   : > { %v1030_v7 = vstv %s1000_s27  ;;  %v1125_v52 = vmul.f32 %v2104_v48, %v1123_v32  ;;  %v2106_v17 = vpop.eup %2105  ;;  %s1368_s27 = scalar_lea.vmem [#allocation2], %s2571_s18 }
 0x30e   : > { %v1031_v14 = vmul.f32 %v1030_v7, %v1029_v10  ;;  %v2108_v1 = vpop.eup %2107  ;;  %v1244_v8 = vadd.f32 1.0, %v2106_v17 }
 0x30f   : > { %v1127_v15 = vmul.f32 %v1126_v26, %v1125_v52 }
 0x310   : > { %v841_v38 = vld [vmem:[%s840_s20] sm:$0x1]  ;;  %2115 = vrcp.f32 %v1244_v8 }
 0x311   : > { %v842_v60 = vadd.f32 %v841_v38, %v839_v36  ;;  %2117 = vpow2.f32 %v1875_v2 }
 0x313   : > { %843 = vst.msk [vmem:[%s840_s20] sm:$0x1] %vm698_vm9, %v842_v60  ;;  %s1048_s20 = scvt.s32.f32 %s1047_s24  ;;  %v1171_v60 = vpop.permute.xlu0 %1170  ;;  %s3099_s24 = sld [smem:[#allocation38_spill]] (!%p2874_p0) }
 0x314   : > { %v1173_v28 = vmul.f32 %v2108_v1, %v1171_v60 }
 0x315   : > { %v1078_v58 = vstv %s1048_s20 }
 0x316   : > { %v1079_v13 = vmul.f32 %v1078_v58, %v1077_v0  ;;  %v1175_v16 = vmul.f32 %v1174_v21, %v1173_v28  ;;  %v1414_v58 = vstv %s1384_s30 }
 0x31a   : > { %v889_v57 = vld [vmem:[%s888_s0] sm:$0x1] }
 0x31b   : > { %v890_v30 = vadd.f32 %v889_v57, %v887_v51  ;;  %v1219_v57 = vpop.permute.xlu1 %1218 }
 0x31d   : > { %891 = vst.msk [vmem:[%s888_s0] sm:$0x1] %vm698_vm9, %v890_v30  ;;  %s3098_s0 = sld [smem:[#allocation30_spill]]  ;;  %v2110_v30 = vpop.eup %2109 }
 0x31e   : > { %v2112_v59 = vpop.eup %2111  ;;  %v1292_v11 = vadd.f32 1.0, %v2110_v30 }
 0x31f   : > { %v1221_v62 = vmul.f32 %v2112_v59, %v1219_v57  ;;  %v1315_v18 = vpop.permute.xlu1 %1314 }
 0x320   : > { %2119 = vrcp.f32 %v1292_v11 }
 0x323   : > { %p1190_p7 = scmp.lt.s32.totalorder %s3098_s0, 20  ;;  %v1411_v50 = vpop.permute.xlu1 %1410 }
 0x324   : > { %v937_v54 = vld [vmem:[%s936_s5] sm:$0x1] }
 0x325   : > { %v938_v41 = vadd.f32 %v937_v54, %v935_v46  ;;  %s1191_s10 = scalar_select %p1190_p7, 1, 0  ;;  %v1267_v46 = vpop.permute.xlu0 %1266  ;;  %v2114_v54 = vpop.eup %2113 }
 0x326   : > { %v1340_v42 = vadd.f32 1.0, %v2114_v54 }
 0x327   : > { %939 = vst.msk [vmem:[%s936_s5] sm:$0x1] %vm698_vm9, %v938_v41  ;;  %s1192_s5 = scvt.s32.f32 %s1191_s10  ;;  %v2116_v41 = vpop.eup %2115 }
 0x328   : > { %v1269_v20 = vmul.f32 %v2116_v41, %v1267_v46  ;;  %2121 = vrcp.f32 %v1340_v42  ;;  %v2118_v3 = vpop.eup %2117 }
 0x329   : > { %v1222_v19 = vstv %s1192_s5  ;;  %v1388_v25 = vadd.f32 1.0, %v2118_v3  ;;  %v1363_v7 = vpop.permute.xlu0 %1362 }
 0x32a   : > { %v1223_v53 = vmul.f32 %v1222_v19, %v1221_v62  ;;  %v1271_v34 = vmul.f32 %v1270_v45, %v1269_v20 }
 0x32b   : > { %2123 = vrcp.f32 %v1388_v25 }
 0x32e   : > { %v985_v49 = vld [vmem:[%s984_s2] sm:$0x1] }
 0x32f   : > { %v986_v9 = vadd.f32 %v985_v49, %v983_v47  ;;  %v2120_v47 = vpop.eup %2119 }
 0x330   : > { %v1317_v49 = vmul.f32 %v2120_v47, %v1315_v18 }
 0x331   : > { %987 = vst.msk [vmem:[%s984_s2] sm:$0x1] %vm698_vm9, %v986_v9  ;;  %v1318_v9 = vstv %s1288_s11  ;;  %s1320_s2 = scalar_lea.vmem [#allocation2], %s2518_s9  ;;  %s1416_s9 = scalar_lea.vmem [#allocation2], %s2561_s1 }
 0x332   : > { %v1319_v61 = vmul.f32 %v1318_v9, %v1317_v49 }
 0x335   : > { %v2122_v37 = vpop.eup %2121 }
 0x336   : > { %v1365_v40 = vmul.f32 %v2122_v37, %v1363_v7 }
 0x338   : > { %v1033_v12 = vld [vmem:[%s1032_s8] sm:$0x1]  ;;  %v2124_v56 = vpop.eup %2123 }
 0x339   : > { %v1034_v27 = vadd.f32 %v1033_v12, %v1031_v14  ;;  %v1366_v14 = vstv %s1336_s23  ;;  %v1413_v0 = vmul.f32 %v2124_v56, %v1411_v50 }
 0x33a   : > { %v1367_v12 = vmul.f32 %v1366_v14, %v1365_v40 }
 0x33b   : > { %1035 = vst.msk [vmem:[%s1032_s8] sm:$0x1] %vm698_vm9, %v1034_v27  ;;  %v1415_v33 = vmul.f32 %v1414_v58, %v1413_v0 }
 0x342   : > { %v1081_v23 = vld [vmem:[%s1080_s21] sm:$0x1] }
 0x343   : > { %v1082_v24 = vadd.f32 %v1081_v23, %v1079_v13 }
 0x345   : > { %1083 = vst.msk [vmem:[%s1080_s21] sm:$0x1] %vm698_vm9, %v1082_v24 }
 0x34c   : > { %v1129_v36 = vld [vmem:[%s1128_s14] sm:$0x1] }
 0x34d   : > { %v1130_v38 = vadd.f32 %v1129_v36, %v1127_v15 }
 0x34f   : > { %1131 = vst.msk [vmem:[%s1128_s14] sm:$0x1] %vm698_vm9, %v1130_v38 }
 0x356   : > { %v1177_v43 = vld [vmem:[%s1176_s28] sm:$0x1] }
 0x357   : > { %v1178_v51 = vadd.f32 %v1177_v43, %v1175_v16 }
 0x359   : > { %1179 = vst.msk [vmem:[%s1176_s28] sm:$0x1] %vm698_vm9, %v1178_v51  ;;  %s3101_s28 = sld [smem:[#allocation39_spill]] (!%p2874_p0) }
 0x360   : > { %v1225_v29 = vld [vmem:[%s1224_s13] sm:$0x1] }
 0x361   : > { %v1226_v55 = vadd.f32 %v1225_v29, %v1223_v53 }
 0x363   : > { %1227 = vst.msk [vmem:[%s1224_s13] sm:$0x1] %vm698_vm9, %v1226_v55  ;;  %s3102_s13 = sld [smem:[#allocation42_spill]] (!%p2874_p0) }
 0x36a   : > { %v1273_v35 = vld [vmem:[%s1272_s17] sm:$0x1] }
 0x36b   : > { %v1274_v22 = vadd.f32 %v1273_v35, %v1271_v34 }
 0x36d   : > { %1275 = vst.msk [vmem:[%s1272_s17] sm:$0x1] %vm698_vm9, %v1274_v22 }
 0x374   : > { %v1321_v6 = vld [vmem:[%s1320_s2] sm:$0x1] }
 0x375   : > { %v1322_v10 = vadd.f32 %v1321_v6, %v1319_v61 }
 0x377   : > { %1323 = vst.msk [vmem:[%s1320_s2] sm:$0x1] %vm698_vm9, %v1322_v10 }
 0x37e   : > { %v1369_v27 = vld [vmem:[%s1368_s27] sm:$0x1] }
 0x37f   : > { %v1370_v31 = vadd.f32 %v1369_v27, %v1367_v12 }
 0x381   : > { %1371 = vst.msk [vmem:[%s1368_s27] sm:$0x1] %vm698_vm9, %v1370_v31 }
 0x387   : > { %1425 = sbr.rel (%p2874_p0) target bundleno = 1600 (0x640), region = 76 }
 0x388   : > { %v1417_v44 = vld [vmem:[%s1416_s9] sm:$0x1] }
 0x389   : > { %v1418_v13 = vadd.f32 %v1417_v44, %v1415_v33 }
 0x38b   : > { %1419 = vst.msk [vmem:[%s1416_s9] sm:$0x1] %vm698_vm9, %v1418_v13 }
 0x38c   : > { %v1437_v23 = vld [vmem:[%s3099_s24 + $0x8] sm:$0xff]  ;;  %vm1427_vm10 = vcmask 130048   ;;  %v2233_v32 = vmov 0.0   ;;  %v1436_v4 = vld [vmem:[%s3099_s24] sm:$0xff]  ;;  %vm2234_vm11 = vmmov 0   ;;  %v1533_v60 = vld [vmem:[%s3100_s16 + $0x18] sm:$0xff] }
 0x38d   : > { %1917 = vmatprep.subr.mxu0 %v2233_v32  ;;  %1921 = vmatprep.mubr.msk.f32.mxu0 %vm2234_vm11, %v2233_v32  ;;  %v1532_v17 = vld [vmem:[%s3100_s16 + $0x10] sm:$0xff]  ;;  %v1531_v1 = vld [vmem:[%s3100_s16 + $0x8] sm:$0xff]  ;;  %v1530_v28 = vld [vmem:[%s3100_s16] sm:$0xff]  ;;  %vm1702_vm15 = vcmask 0  }
 0x38e   : > { %1918 = vmatpush3.msra.mxu0 %v1437_v23  ;;  %1924 = vmatprep.subr.mxu1 %v2233_v32  ;;  %v1438_v21 = vld [vmem:[%s3101_s28] sm:$0x1]  ;;  %v1627_v20 = vld [vmem:[%s3102_s13 + $0x8] sm:$0xff] }
 0x38f   : > { %1919 = vmatprep.subr.mxu0 %v2233_v32  ;;  %1932 = vmatprep.mubr.msk.f32.mxu1 %vm2234_vm11, %v2233_v32  ;;  %v1626_v45 = vld [vmem:[%s3102_s13] sm:$0xff]  ;;  %v1628_v31 = vld [vmem:[#allocation9] sm:$0x1] }
 0x390   : > { %1920 = vmatpush3.msra.mxu0 %v1436_v4  ;;  %1925 = vmatpush3.msra.mxu1 %v1533_v60  ;;  %v1534_v42 = vld [vmem:[%s3103_s6] sm:$0x1] }
 0x391   : > { %1935 = vmatprep.subr.mxu0 %v2233_v32  ;;  %1926 = vmatprep.subr.mxu1 %v2233_v32 }
 0x392   : > { %v1426_v24 = vld [vmem:[#allocation2] sm:$0xff]  ;;  %1927 = vmatpush3.msra.mxu1 %v1532_v17 }
 0x393   : > { %v1428_v48 = vsel %vm1427_vm10, %v1426_v24, 0.0  ;;  %1928 = vmatprep.subr.mxu1 %v2233_v32 }
 0x394   : > { %v1429_v52 = vrot.slane %v1428_v48, 4  ;;  %1929 = vmatpush3.msra.mxu1 %v1531_v1 }
 0x395   : > { %1930 = vmatprep.subr.mxu1 %v2233_v32 }
 0x396   : > { %v1430_v26 = vadd.f32 %v1429_v52, %v1428_v48  ;;  %1931 = vmatpush3.msra.mxu1 %v1530_v28 }
 0x398   : > { %v1431_v5 = vrot.slane %v1430_v26, 2 }
 0x39a   : > { %v1432_v39 = vadd.f32 %v1431_v5, %v1430_v26 }
 0x39c   : > { %v1433_v15 = vrot.slane %v1432_v39, 1 }
 0x39e   : > { %v1434_v36 = vadd.f32 %v1433_v15, %v1432_v39 }
 0x3a0   : > { %v1435_v38 = vmul.f32 0.125, %v1434_v36 }
 0x3a2   : > { %1922 = vmatmul.mubr.msk.f32.vlgmr.msra.gmra.mxu0 %vm1427_vm10, %v1435_v38 }
 0x3a3   : > { %1939 = vmatprep.mubr.msk.f32.mxu0 %vm2234_vm11, %v2233_v32  ;;  %1936 = vmatpush3.msra.mxu0 %v1627_v20 }
 0x3a4   : > { %1937 = vmatprep.subr.mxu0 %v2233_v32 }
 0x3a5   : > { %1938 = vmatpush3.msra.mxu0 %v1626_v45 }
 0x462   : > { %v1508_v63 = vpop.f32.mrf.mxu0 }
 0x463   : > { %v1509_v8 = vadd.f32 %v1508_v63, %v1438_v21 }
 0x464   : > { %v1923_v16 = vpop.f32.mrf.mxu0 }
 0x465   : > { %v1515_v43 = vand.u32 2147483647, %v1509_v8  ;;  %v1512_v55 = vmax.f32 %v1509_v8, 0.0  ;;  %vm1513_vm13 = vcmp.ne.f32.partialorder %v1509_v8, %v1509_v8 }
 0x467   : > { %v1516_v51 = vsub.f32 0.0, %v1515_v43 }
 0x469   : > { %v1517_v57 = vmul.f32 1.442695, %v1516_v51 }
 0x46b   : > { %2125 = vpow2.f32 %v1517_v57 }
 0x478   : > { %v2126_v30 = vpop.eup %2125 }
 0x479   : > { %v1519_v59 = vadd.f32 1.0, %v2126_v30  ;;  %v1522_v62 = vmul.f32 -0.5, %v2126_v30  ;;  %v1525_v2 = vand.u32 2147483647, %v2126_v30 }
 0x47b   : > { %2127 = vlog2.f32 %v1519_v59  ;;  %v1523_v19 = vadd.f32 1.0, %v1522_v62  ;;  %vm1526_vm12 = vcmp.lt.f32.partialorder %v1525_v2, 0.0004427343 }
 0x47d   : > { %v1524_v29 = vmul.f32 %v2126_v30, %v1523_v19 }
 0x488   : > { %v2128_v11 = vpop.eup %2127 }
 0x489   : > { %v1521_v53 = vmul.f32 0.6931472, %v2128_v11 }
 0x48b   : > { %v1527_v46 = vsel %vm1526_vm12, %v1524_v29, %v1521_v53 }
 0x48c   : > { %v1528_v54 = vadd.f32 %v1527_v46, %v1512_v55 }
 0x48e   : > { %v1529_v41 = vsel %vm1513_vm13, %v1509_v8, %v1528_v54 }
 0x48f   : > { %1933 = vmatmul.mubr.msk.f32.vlgmr.msra.gmra.mxu1 %vm648_vm6, %v1529_v41 }
 0x54f   : > { %v1604_v34 = vpop.f32.mrf.mxu1 }
 0x550   : > { %v1605_v35 = vadd.f32 %v1604_v34, %v1534_v42 }
 0x551   : > { %v1934_v22 = vpop.f32.mrf.mxu1 }
 0x552   : > { %v1611_v18 = vand.u32 2147483647, %v1605_v35  ;;  %v1608_v40 = vmax.f32 %v1605_v35, 0.0  ;;  %vm1609_vm14 = vcmp.ne.f32.partialorder %v1605_v35, %v1605_v35 }
 0x554   : > { %v1612_v3 = vsub.f32 0.0, %v1611_v18 }
 0x556   : > { %v1613_v47 = vmul.f32 1.442695, %v1612_v3 }
 0x558   : > { %2129 = vpow2.f32 %v1613_v47 }
 0x565   : > { %v2130_v49 = vpop.eup %2129 }
 0x566   : > { %v1615_v9 = vadd.f32 1.0, %v2130_v49  ;;  %v1618_v25 = vmul.f32 -0.5, %v2130_v49  ;;  %v1621_v6 = vand.u32 2147483647, %v2130_v49 }
 0x568   : > { %2131 = vlog2.f32 %v1615_v9  ;;  %v1619_v61 = vadd.f32 1.0, %v1618_v25  ;;  %vm1622_vm6 = vcmp.lt.f32.partialorder %v1621_v6, 0.0004427343 }
 0x56a   : > { %v1620_v37 = vmul.f32 %v2130_v49, %v1619_v61 }
 0x575   : > { %v2132_v10 = vpop.eup %2131 }
 0x576   : > { %v1617_v7 = vmul.f32 0.6931472, %v2132_v10 }
 0x578   : > { %v1623_v14 = vsel %vm1622_vm6, %v1620_v37, %v1617_v7 }
 0x579   : > { %v1624_v12 = vadd.f32 %v1623_v14, %v1608_v40 }
 0x57b   : > { %v1625_v27 = vsel %vm1609_vm14, %v1605_v35, %v1624_v12 }
 0x57c   : > { %1940 = vmatmul.mubr.msk.f32.vlgmr.msra.gmra.mxu0 %vm1427_vm10, %v1625_v27 }
 0x63c   : > { %v1698_v50 = vpop.f32.mrf.mxu0 }
 0x63d   : > { %v1699_v56 = vadd.f32 %v1698_v50, %v1628_v31 }
 0x63e   : > { %v1941_v0 = vpop.f32.mrf.mxu0 }
 0x63f   : > { %1703 = vst.msk [vmem:[#allocation10] sm:$0x1] %vm1702_vm15, %v1699_v56 }
 0x640 PF: > { %s3104_s2 = sld [smem:[#allocation18_spill]]  ;;  %s2235_s27 = smov [#allocation10]  }
 0x641   : > { %s1711_s30 = sshll.u32 %s2235_s27, 4  ;;  %s1712_s30 = int_to_ptr.vmem [resolvable:$true] %s1711_s30 }
 0x642   : > { %s2157_s9 = scalar_lea.vmem %s1712_s30, 16  ;;  %s2163_s12 = scalar_lea.vmem %s1712_s30, 32 }
 0x643   : > { %p2158_p13 = scmp.ne.s32.totalorder %s1712_s30, %s2157_s9  ;;  %p2164_p2 = scmp.lt.s32.totalorder %s1712_s30, %s1712_s30 }
 0x644   : > { %p2165_p3 = scmp.lt.s32.totalorder %s2163_s12, %s2157_s9 }
 0x646   : > { %s3105_s23 = sadd.s32 4294967295, %s3104_s2   ;;  %p2166_p4 = por %p2165_p3, %p2164_p2 }
 0x647   : > { %p2964_p12 = scmp.eq.s32.totalorder %s3105_s23, 5 }
 0x649   : > { %p2159_p0 = pnand %p2158_p13, %p2964_p12 }
 0x64b   : > { %p2160_p1 = pneg %p2159_p0 }
 0x64d   : > { %p2167_p5 = pnand %p2166_p4, %p2160_p1 }
 0x64f   : > { %2170 = shalt.err (!%p2167_p5)
}
 0x650   : > { %s3107_s20 = sld [smem:[#allocation43_spill]] }
 0x656   : > { %1943 = dma.vmem_to_hbm [thread:$0]  (%p2964_p12), %s1712_s30, 16, %s3107_s20, [#allocation11]  }
 0x657   : > { %2204 = dma.done.wait (%p2964_p12), [#allocation11], 16  }
 0x658   : > { %2206 = vsyncadd (%p2964_p12), [#allocation11], 4294967280 }
 0x659 PF: > { %s3108_s1 = sld [smem:[#allocation18_spill]] }
 0x65a   : > { %s3109_s12 = sld [smem:[#allocation16_spill]] }
 0x65b   : > { %s3110_s18 = sld [smem:[#allocation17_spill]] }
 0x65c   : > { %s3111_s19 = sld [smem:[#allocation19_spill]] }
 0x65d   : > { %s3112_s20 = sld [smem:[#allocation20_spill]] }
 0x65f   : > { %s36_s21 = sadd.s32 1, %s3108_s1  }
 0x660   : > { %p33_p6 = scmp.ge.s32.totalorder %s36_s21, 8  }
 0x662   :  { %35 = sbr.rel (!%p33_p6) target bundleno = 31 (0x1f), region = 160 }
 0x667   :  { %1724 = vsyncpa [#allocation11], 1 }
 0x668   :  { %1726 = vsyncpa [#allocation11 + $0x1], 1 }

</bundles_post_ra>
